<compile_context>
chip_gen: v7x
topology: tpu7x:2x2x1
jax: 0.10.0
libtpu: 0.0.40
codegen_flags: <defaults>
</compile_context>

<pallas_src>
import jax
import jax.numpy as jnp
from jax.experimental import pallas as pl
from jax.experimental.pallas import tpu as pltpu


def _pam_kernel(x_ref, y_ref,
                wq_ref, bq_ref,
                wk_ref, bk_ref,
                wv_ref, bv_ref,
                gamma_ref,
                out_ref):
    # x_ref / y_ref / out_ref : (b_tile, C, h_tile, W) VMEM tiles (NCHW blocks)
    # wq/wk/wv : (C, C) f32 in SMEM; bq/bk/bv : (C,) f32 in SMEM
    # gamma    : (1,) f32 in SMEM
    b_tile = out_ref.shape[0]
    C = out_ref.shape[1]
    gamma = gamma_ref[0]

    for bi in range(b_tile):            # static, fully unrolled (b_tile small)
        # Hoist per-input-channel slabs (leading-dim slices are cheap views).
        y_slabs = [y_ref[bi, c] for c in range(C)]   # each (h_tile, W)
        x_slabs = [x_ref[bi, c] for c in range(C)]

        for o in range(C):               # static, fully unrolled (C is small)
            # 1x1 convs: channel contraction with scalar weights from SMEM.
            # Bias seeds the accumulator; y[c] is reused for both q and k.
            q_o = bq_ref[o]
            k_o = bk_ref[o]
            v_o = bv_ref[o]
            for c in range(C):
                y_c = y_slabs[c]
                x_c = x_slabs[c]
                q_o = q_o + wq_ref[o, c] * y_c
                k_o = k_o + wk_ref[o, c] * y_c
                v_o = v_o + wv_ref[o, c] * x_c

            energy = q_o * k_o                               # (h_tile, W)

            # Numerically-stable softmax over the last (W / lane) axis.
            m = jnp.max(energy, axis=-1, keepdims=True)
            p = jnp.exp(energy - m)
            denom = jnp.sum(p, axis=-1, keepdims=True)
            # Fold gamma into the per-row normalizer (EUP vrcp; one fewer
            # full-slab multiply per channel).
            scale = gamma * pl.reciprocal(denom, approx=True)  # (h_tile, 1)

            out_ref[bi, o] = p * scale + v_o


def _pick_b_tile(B, C, h_tile, W, itemsize,
                 vmem_budget_bytes=8 * 1024 * 1024, max_unroll=512):
    """Largest divisor of B whose block fits the VMEM budget (x, y, out are
    each double-buffered by the pipeline) and keeps the static unroll bounded."""
    best = 1
    for bt in range(1, B + 1):
        if B % bt:
            continue
        block_bytes = bt * C * h_tile * W * itemsize
        if 3 * 2 * block_bytes > vmem_budget_bytes:
            continue
        if bt * C * C > max_unroll:
            continue
        best = bt
    return best


def pam_module(x, y, wq, bq, wk, bk, wv, bv, gamma, *, b_tile=None, h_tile=None):
    """x, y: (B, C, H, W) float32.  Returns (B, C, H, W) float32."""
    B, C, H, W = x.shape
    assert y.shape == x.shape

    if h_tile is None:
        h_tile = H                       # whole image per grid step by default
    assert H % h_tile == 0 and (h_tile == H or h_tile % 8 == 0)

    if b_tile is None:
        b_tile = _pick_b_tile(B, C, h_tile, W, x.dtype.itemsize)
    assert B % b_tile == 0

    tile_spec = pl.BlockSpec((b_tile, C, h_tile, W), lambda b, h: (b, 0, h, 0))
    smem_spec = pl.BlockSpec(memory_space=pltpu.MemorySpace.SMEM)

    out = pl.pallas_call(
        _pam_kernel,
        out_shape=jax.ShapeDtypeStruct((B, C, H, W), jnp.float32),
        grid=(B // b_tile, H // h_tile),
        in_specs=[tile_spec, tile_spec,
                  smem_spec, smem_spec,
                  smem_spec, smem_spec,
                  smem_spec, smem_spec,
                  smem_spec],
        out_specs=tile_spec,
        compiler_params=pltpu.CompilerParams(
            dimension_semantics=("parallel", "parallel"),
            vmem_limit_bytes=32 * 1024 * 1024),
    )(x, y, wq, bq, wk, bk, wv, bv, gamma)
    return out


def _reference(x, y, wq, bq, wk, bk, wv, bv, gamma):
    """Pure-JAX reference matching the PyTorch forward (NCHW)."""
    def conv1x1(inp, w, b):
        return jnp.einsum('oc,bchw->bohw', w, inp) + b[None, :, None, None]

    q = conv1x1(y, wq, bq)
    k = conv1x1(y, wk, bk)
    v = conv1x1(x, wv, bv)
    energy = q * k
    attn = jax.nn.softmax(energy, axis=-1)
    return gamma[0] * attn + v


if __name__ == "__main__":
    B, C, H, W = 2, 4, 16, 16

    key = jax.random.PRNGKey(0)
    kx, ky, k1, k2, k3, k4, k5, k6 = jax.random.split(key, 8)

    x = jax.random.normal(kx, (B, C, H, W), dtype=jnp.float32)
    y = jax.random.normal(ky, (B, C, H, W), dtype=jnp.float32)

    # Deterministic synthetic parameters (Conv2d(C, C, kernel_size=1) each).
    scale = 1.0 / jnp.sqrt(jnp.float32(C))
    wq = jax.random.normal(k1, (C, C), dtype=jnp.float32) * scale
    bq = jax.random.normal(k2, (C,), dtype=jnp.float32) * 0.1
    wk = jax.random.normal(k3, (C, C), dtype=jnp.float32) * scale
    bk = jax.random.normal(k4, (C,), dtype=jnp.float32) * 0.1
    wv = jax.random.normal(k5, (C, C), dtype=jnp.float32) * scale
    bv = jax.random.normal(k6, (C,), dtype=jnp.float32) * 0.1
    # nn.Parameter(torch.zeros(1)) -> gamma starts at 0; use a nonzero value
    # so the attention branch of the kernel is actually exercised.
    gamma = jnp.array([0.5], dtype=jnp.float32)

    out = pam_module(x, y, wq, bq, wk, bk, wv, bv, gamma)
    out = jax.block_until_ready(out)

    ref = _reference(x, y, wq, bq, wk, bk, wv, bv, gamma)
    assert out.shape == (B, C, H, W)
    # approx=True reciprocal (EUP) has ~1e-4 relative error on the softmax
    # denominator, hence the slightly looser tolerance vs. the f32 reference.
    max_err = jnp.max(jnp.abs(out - ref))
    assert jnp.allclose(out, ref, atol=1e-3, rtol=1e-3), (
        f"max abs err = {max_err}")

    print("KERNEL_OK")
</pallas_src>

<mosaic_0001>
module attributes {stable_mosaic.version = 11 : i64} {
  func.func @_pam_kernel(%arg0: i32, %arg1: i32, %arg2: memref<2x4x16x16xf32, #tpu.memory_space<vmem>>, %arg3: memref<2x4x16x16xf32, #tpu.memory_space<vmem>>, %arg4: memref<4x4xf32, #tpu.memory_space<smem>>, %arg5: memref<4xf32, #tpu.memory_space<smem>>, %arg6: memref<4x4xf32, #tpu.memory_space<smem>>, %arg7: memref<4xf32, #tpu.memory_space<smem>>, %arg8: memref<4x4xf32, #tpu.memory_space<smem>>, %arg9: memref<4xf32, #tpu.memory_space<smem>>, %arg10: memref<1xf32, #tpu.memory_space<smem>>, %arg11: memref<2x4x16x16xf32, #tpu.memory_space<vmem>>) attributes {dimension_semantics = [#tpu.dimension_semantics<parallel>, #tpu.dimension_semantics<parallel>], iteration_bounds = array<i64: 1, 1>, scalar_prefetch = 0 : i64, scratch_operands = 0 : i64, tpu.core_type = #tpu.core_type<tc>, window_params = [{transform_indices = @transform_0, window_bounds = array<i64: 2, 4, 16, 16>}, {transform_indices = @transform_1, window_bounds = array<i64: 2, 4, 16, 16>}, {transform_indices = @transform_2, window_bounds = array<i64: 4, 4>}, {transform_indices = @transform_3, window_bounds = array<i64: 4>}, {transform_indices = @transform_4, window_bounds = array<i64: 4, 4>}, {transform_indices = @transform_5, window_bounds = array<i64: 4>}, {transform_indices = @transform_6, window_bounds = array<i64: 4, 4>}, {transform_indices = @transform_7, window_bounds = array<i64: 4>}, {transform_indices = @transform_8, window_bounds = array<i64: 1>}, {transform_indices = @transform_9, window_bounds = array<i64: 2, 4, 16, 16>}]} {
    %c0 = arith.constant 0 : index
    %0 = memref.load %arg10[%c0] : memref<1xf32, #tpu.memory_space<smem>>
    %c0_0 = arith.constant 0 : index
    %c0_1 = arith.constant 0 : index
    %c0_2 = arith.constant 0 : index
    %c0_3 = arith.constant 0 : index
    %1 = vector.load %arg3[%c0_0, %c0_1, %c0_2, %c0_3] : memref<2x4x16x16xf32, #tpu.memory_space<vmem>>, vector<1x1x16x16xf32>
    %2 = vector.shape_cast %1 : vector<1x1x16x16xf32> to vector<16x16xf32>
    %c0_4 = arith.constant 0 : index
    %c1 = arith.constant 1 : index
    %c0_5 = arith.constant 0 : index
    %c0_6 = arith.constant 0 : index
    %3 = vector.load %arg3[%c0_4, %c1, %c0_5, %c0_6] : memref<2x4x16x16xf32, #tpu.memory_space<vmem>>, vector<1x1x16x16xf32>
    %4 = vector.shape_cast %3 : vector<1x1x16x16xf32> to vector<16x16xf32>
    %c0_7 = arith.constant 0 : index
    %c2 = arith.constant 2 : index
    %c0_8 = arith.constant 0 : index
    %c0_9 = arith.constant 0 : index
    %5 = vector.load %arg3[%c0_7, %c2, %c0_8, %c0_9] : memref<2x4x16x16xf32, #tpu.memory_space<vmem>>, vector<1x1x16x16xf32>
    %6 = vector.shape_cast %5 : vector<1x1x16x16xf32> to vector<16x16xf32>
    %c0_10 = arith.constant 0 : index
    %c3 = arith.constant 3 : index
    %c0_11 = arith.constant 0 : index
    %c0_12 = arith.constant 0 : index
    %7 = vector.load %arg3[%c0_10, %c3, %c0_11, %c0_12] : memref<2x4x16x16xf32, #tpu.memory_space<vmem>>, vector<1x1x16x16xf32>
    %8 = vector.shape_cast %7 : vector<1x1x16x16xf32> to vector<16x16xf32>
    %c0_13 = arith.constant 0 : index
    %c0_14 = arith.constant 0 : index
    %c0_15 = arith.constant 0 : index
    %c0_16 = arith.constant 0 : index
    %9 = vector.load %arg2[%c0_13, %c0_14, %c0_15, %c0_16] : memref<2x4x16x16xf32, #tpu.memory_space<vmem>>, vector<1x1x16x16xf32>
    %10 = vector.shape_cast %9 : vector<1x1x16x16xf32> to vector<16x16xf32>
    %c0_17 = arith.constant 0 : index
    %c1_18 = arith.constant 1 : index
    %c0_19 = arith.constant 0 : index
    %c0_20 = arith.constant 0 : index
    %11 = vector.load %arg2[%c0_17, %c1_18, %c0_19, %c0_20] : memref<2x4x16x16xf32, #tpu.memory_space<vmem>>, vector<1x1x16x16xf32>
    %12 = vector.shape_cast %11 : vector<1x1x16x16xf32> to vector<16x16xf32>
    %c0_21 = arith.constant 0 : index
    %c2_22 = arith.constant 2 : index
    %c0_23 = arith.constant 0 : index
    %c0_24 = arith.constant 0 : index
    %13 = vector.load %arg2[%c0_21, %c2_22, %c0_23, %c0_24] : memref<2x4x16x16xf32, #tpu.memory_space<vmem>>, vector<1x1x16x16xf32>
    %14 = vector.shape_cast %13 : vector<1x1x16x16xf32> to vector<16x16xf32>
    %c0_25 = arith.constant 0 : index
    %c3_26 = arith.constant 3 : index
    %c0_27 = arith.constant 0 : index
    %c0_28 = arith.constant 0 : index
    %15 = vector.load %arg2[%c0_25, %c3_26, %c0_27, %c0_28] : memref<2x4x16x16xf32, #tpu.memory_space<vmem>>, vector<1x1x16x16xf32>
    %16 = vector.shape_cast %15 : vector<1x1x16x16xf32> to vector<16x16xf32>
    %c0_29 = arith.constant 0 : index
    %17 = memref.load %arg5[%c0_29] : memref<4xf32, #tpu.memory_space<smem>>
    %c0_30 = arith.constant 0 : index
    %18 = memref.load %arg7[%c0_30] : memref<4xf32, #tpu.memory_space<smem>>
    %c0_31 = arith.constant 0 : index
    %19 = memref.load %arg9[%c0_31] : memref<4xf32, #tpu.memory_space<smem>>
    %c0_32 = arith.constant 0 : index
    %c0_33 = arith.constant 0 : index
    %20 = memref.load %arg4[%c0_32, %c0_33] : memref<4x4xf32, #tpu.memory_space<smem>>
    %21 = vector.broadcast %20 : f32 to vector<16x16xf32>
    %22 = arith.mulf %21, %2 : vector<16x16xf32>
    %23 = vector.broadcast %17 : f32 to vector<16x16xf32>
    %24 = arith.addf %23, %22 : vector<16x16xf32>
    %c0_34 = arith.constant 0 : index
    %c0_35 = arith.constant 0 : index
    %25 = memref.load %arg6[%c0_34, %c0_35] : memref<4x4xf32, #tpu.memory_space<smem>>
    %26 = vector.broadcast %25 : f32 to vector<16x16xf32>
    %27 = arith.mulf %26, %2 : vector<16x16xf32>
    %28 = vector.broadcast %18 : f32 to vector<16x16xf32>
    %29 = arith.addf %28, %27 : vector<16x16xf32>
    %c0_36 = arith.constant 0 : index
    %c0_37 = arith.constant 0 : index
    %30 = memref.load %arg8[%c0_36, %c0_37] : memref<4x4xf32, #tpu.memory_space<smem>>
    %31 = vector.broadcast %30 : f32 to vector<16x16xf32>
    %32 = arith.mulf %31, %10 : vector<16x16xf32>
    %33 = vector.broadcast %19 : f32 to vector<16x16xf32>
    %34 = arith.addf %33, %32 : vector<16x16xf32>
    %c0_38 = arith.constant 0 : index
    %c1_39 = arith.constant 1 : index
    %35 = memref.load %arg4[%c0_38, %c1_39] : memref<4x4xf32, #tpu.memory_space<smem>>
    %36 = vector.broadcast %35 : f32 to vector<16x16xf32>
    %37 = arith.mulf %36, %4 : vector<16x16xf32>
    %38 = arith.addf %24, %37 : vector<16x16xf32>
    %c0_40 = arith.constant 0 : index
    %c1_41 = arith.constant 1 : index
    %39 = memref.load %arg6[%c0_40, %c1_41] : memref<4x4xf32, #tpu.memory_space<smem>>
    %40 = vector.broadcast %39 : f32 to vector<16x16xf32>
    %41 = arith.mulf %40, %4 : vector<16x16xf32>
    %42 = arith.addf %29, %41 : vector<16x16xf32>
    %c0_42 = arith.constant 0 : index
    %c1_43 = arith.constant 1 : index
    %43 = memref.load %arg8[%c0_42, %c1_43] : memref<4x4xf32, #tpu.memory_space<smem>>
    %44 = vector.broadcast %43 : f32 to vector<16x16xf32>
    %45 = arith.mulf %44, %12 : vector<16x16xf32>
    %46 = arith.addf %34, %45 : vector<16x16xf32>
    %c0_44 = arith.constant 0 : index
    %c2_45 = arith.constant 2 : index
    %47 = memref.load %arg4[%c0_44, %c2_45] : memref<4x4xf32, #tpu.memory_space<smem>>
    %48 = vector.broadcast %47 : f32 to vector<16x16xf32>
    %49 = arith.mulf %48, %6 : vector<16x16xf32>
    %50 = arith.addf %38, %49 : vector<16x16xf32>
    %c0_46 = arith.constant 0 : index
    %c2_47 = arith.constant 2 : index
    %51 = memref.load %arg6[%c0_46, %c2_47] : memref<4x4xf32, #tpu.memory_space<smem>>
    %52 = vector.broadcast %51 : f32 to vector<16x16xf32>
    %53 = arith.mulf %52, %6 : vector<16x16xf32>
    %54 = arith.addf %42, %53 : vector<16x16xf32>
    %c0_48 = arith.constant 0 : index
    %c2_49 = arith.constant 2 : index
    %55 = memref.load %arg8[%c0_48, %c2_49] : memref<4x4xf32, #tpu.memory_space<smem>>
    %56 = vector.broadcast %55 : f32 to vector<16x16xf32>
    %57 = arith.mulf %56, %14 : vector<16x16xf32>
    %58 = arith.addf %46, %57 : vector<16x16xf32>
    %c0_50 = arith.constant 0 : index
    %c3_51 = arith.constant 3 : index
    %59 = memref.load %arg4[%c0_50, %c3_51] : memref<4x4xf32, #tpu.memory_space<smem>>
    %60 = vector.broadcast %59 : f32 to vector<16x16xf32>
    %61 = arith.mulf %60, %8 : vector<16x16xf32>
    %62 = arith.addf %50, %61 : vector<16x16xf32>
    %c0_52 = arith.constant 0 : index
    %c3_53 = arith.constant 3 : index
    %63 = memref.load %arg6[%c0_52, %c3_53] : memref<4x4xf32, #tpu.memory_space<smem>>
    %64 = vector.broadcast %63 : f32 to vector<16x16xf32>
    %65 = arith.mulf %64, %8 : vector<16x16xf32>
    %66 = arith.addf %54, %65 : vector<16x16xf32>
    %c0_54 = arith.constant 0 : index
    %c3_55 = arith.constant 3 : index
    %67 = memref.load %arg8[%c0_54, %c3_55] : memref<4x4xf32, #tpu.memory_space<smem>>
    %68 = vector.broadcast %67 : f32 to vector<16x16xf32>
    %69 = arith.mulf %68, %16 : vector<16x16xf32>
    %70 = arith.addf %58, %69 : vector<16x16xf32>
    %71 = arith.mulf %62, %66 : vector<16x16xf32>
    %cst = arith.constant dense<0xFF800000> : vector<16xf32>
    %72 = vector.multi_reduction <maximumf>, %71, %cst [1] : vector<16x16xf32> to vector<16xf32>
    %73 = vector.shape_cast %72 : vector<16xf32> to vector<16x1xf32>
    %74 = vector.broadcast %73 : vector<16x1xf32> to vector<16x16xf32>
    %75 = arith.subf %71, %74 : vector<16x16xf32>
    %76 = math.exp %75 : vector<16x16xf32>
    %cst_56 = arith.constant dense<0.000000e+00> : vector<16xf32>
    %77 = vector.multi_reduction <add>, %76, %cst_56 [1] : vector<16x16xf32> to vector<16xf32>
    %78 = vector.shape_cast %77 : vector<16xf32> to vector<16x1xf32>
    %79 = tpu.reciprocal %78 {approx = true} : vector<16x1xf32> -> vector<16x1xf32>
    %80 = vector.broadcast %0 : f32 to vector<16x1xf32>
    %81 = arith.mulf %80, %79 : vector<16x1xf32>
    %82 = vector.broadcast %81 : vector<16x1xf32> to vector<16x16xf32>
    %83 = arith.mulf %76, %82 : vector<16x16xf32>
    %84 = arith.addf %83, %70 : vector<16x16xf32>
    %c0_57 = arith.constant 0 : index
    %c0_58 = arith.constant 0 : index
    %c0_59 = arith.constant 0 : index
    %c0_60 = arith.constant 0 : index
    %85 = vector.load %arg11[%c0_57, %c0_58, %c0_59, %c0_60] : memref<2x4x16x16xf32, #tpu.memory_space<vmem>>, vector<1x1x16x16xf32>
    %86 = vector.shape_cast %85 : vector<1x1x16x16xf32> to vector<16x16xf32>
    %87 = vector.shape_cast %84 : vector<16x16xf32> to vector<1x1x16x16xf32>
    tpu.vector_store %arg11[%c0_57, %c0_58, %c0_59, %c0_60], %87 {strides = array<i32>} : memref<2x4x16x16xf32, #tpu.memory_space<vmem>>, vector<1x1x16x16xf32>,
    %c1_61 = arith.constant 1 : index
    %88 = memref.load %arg5[%c1_61] : memref<4xf32, #tpu.memory_space<smem>>
    %c1_62 = arith.constant 1 : index
    %89 = memref.load %arg7[%c1_62] : memref<4xf32, #tpu.memory_space<smem>>
    %c1_63 = arith.constant 1 : index
    %90 = memref.load %arg9[%c1_63] : memref<4xf32, #tpu.memory_space<smem>>
    %c1_64 = arith.constant 1 : index
    %c0_65 = arith.constant 0 : index
    %91 = memref.load %arg4[%c1_64, %c0_65] : memref<4x4xf32, #tpu.memory_space<smem>>
    %92 = vector.broadcast %91 : f32 to vector<16x16xf32>
    %93 = arith.mulf %92, %2 : vector<16x16xf32>
    %94 = vector.broadcast %88 : f32 to vector<16x16xf32>
    %95 = arith.addf %94, %93 : vector<16x16xf32>
    %c1_66 = arith.constant 1 : index
    %c0_67 = arith.constant 0 : index
    %96 = memref.load %arg6[%c1_66, %c0_67] : memref<4x4xf32, #tpu.memory_space<smem>>
    %97 = vector.broadcast %96 : f32 to vector<16x16xf32>
    %98 = arith.mulf %97, %2 : vector<16x16xf32>
    %99 = vector.broadcast %89 : f32 to vector<16x16xf32>
    %100 = arith.addf %99, %98 : vector<16x16xf32>
    %c1_68 = arith.constant 1 : index
    %c0_69 = arith.constant 0 : index
    %101 = memref.load %arg8[%c1_68, %c0_69] : memref<4x4xf32, #tpu.memory_space<smem>>
    %102 = vector.broadcast %101 : f32 to vector<16x16xf32>
    %103 = arith.mulf %102, %10 : vector<16x16xf32>
    %104 = vector.broadcast %90 : f32 to vector<16x16xf32>
    %105 = arith.addf %104, %103 : vector<16x16xf32>
    %c1_70 = arith.constant 1 : index
    %c1_71 = arith.constant 1 : index
    %106 = memref.load %arg4[%c1_70, %c1_71] : memref<4x4xf32, #tpu.memory_space<smem>>
    %107 = vector.broadcast %106 : f32 to vector<16x16xf32>
    %108 = arith.mulf %107, %4 : vector<16x16xf32>
    %109 = arith.addf %95, %108 : vector<16x16xf32>
    %c1_72 = arith.constant 1 : index
    %c1_73 = arith.constant 1 : index
    %110 = memref.load %arg6[%c1_72, %c1_73] : memref<4x4xf32, #tpu.memory_space<smem>>
    %111 = vector.broadcast %110 : f32 to vector<16x16xf32>
    %112 = arith.mulf %111, %4 : vector<16x16xf32>
    %113 = arith.addf %100, %112 : vector<16x16xf32>
    %c1_74 = arith.constant 1 : index
    %c1_75 = arith.constant 1 : index
    %114 = memref.load %arg8[%c1_74, %c1_75] : memref<4x4xf32, #tpu.memory_space<smem>>
    %115 = vector.broadcast %114 : f32 to vector<16x16xf32>
    %116 = arith.mulf %115, %12 : vector<16x16xf32>
    %117 = arith.addf %105, %116 : vector<16x16xf32>
    %c1_76 = arith.constant 1 : index
    %c2_77 = arith.constant 2 : index
    %118 = memref.load %arg4[%c1_76, %c2_77] : memref<4x4xf32, #tpu.memory_space<smem>>
    %119 = vector.broadcast %118 : f32 to vector<16x16xf32>
    %120 = arith.mulf %119, %6 : vector<16x16xf32>
    %121 = arith.addf %109, %120 : vector<16x16xf32>
    %c1_78 = arith.constant 1 : index
    %c2_79 = arith.constant 2 : index
    %122 = memref.load %arg6[%c1_78, %c2_79] : memref<4x4xf32, #tpu.memory_space<smem>>
    %123 = vector.broadcast %122 : f32 to vector<16x16xf32>
    %124 = arith.mulf %123, %6 : vector<16x16xf32>
    %125 = arith.addf %113, %124 : vector<16x16xf32>
    %c1_80 = arith.constant 1 : index
    %c2_81 = arith.constant 2 : index
    %126 = memref.load %arg8[%c1_80, %c2_81] : memref<4x4xf32, #tpu.memory_space<smem>>
    %127 = vector.broadcast %126 : f32 to vector<16x16xf32>
    %128 = arith.mulf %127, %14 : vector<16x16xf32>
    %129 = arith.addf %117, %128 : vector<16x16xf32>
    %c1_82 = arith.constant 1 : index
    %c3_83 = arith.constant 3 : index
    %130 = memref.load %arg4[%c1_82, %c3_83] : memref<4x4xf32, #tpu.memory_space<smem>>
    %131 = vector.broadcast %130 : f32 to vector<16x16xf32>
    %132 = arith.mulf %131, %8 : vector<16x16xf32>
    %133 = arith.addf %121, %132 : vector<16x16xf32>
    %c1_84 = arith.constant 1 : index
    %c3_85 = arith.constant 3 : index
    %134 = memref.load %arg6[%c1_84, %c3_85] : memref<4x4xf32, #tpu.memory_space<smem>>
    %135 = vector.broadcast %134 : f32 to vector<16x16xf32>
    %136 = arith.mulf %135, %8 : vector<16x16xf32>
    %137 = arith.addf %125, %136 : vector<16x16xf32>
    %c1_86 = arith.constant 1 : index
    %c3_87 = arith.constant 3 : index
    %138 = memref.load %arg8[%c1_86, %c3_87] : memref<4x4xf32, #tpu.memory_space<smem>>
    %139 = vector.broadcast %138 : f32 to vector<16x16xf32>
    %140 = arith.mulf %139, %16 : vector<16x16xf32>
    %141 = arith.addf %129, %140 : vector<16x16xf32>
    %142 = arith.mulf %133, %137 : vector<16x16xf32>
    %cst_88 = arith.constant dense<0xFF800000> : vector<16xf32>
    %143 = vector.multi_reduction <maximumf>, %142, %cst_88 [1] : vector<16x16xf32> to vector<16xf32>
    %144 = vector.shape_cast %143 : vector<16xf32> to vector<16x1xf32>
    %145 = vector.broadcast %144 : vector<16x1xf32> to vector<16x16xf32>
    %146 = arith.subf %142, %145 : vector<16x16xf32>
    %147 = math.exp %146 : vector<16x16xf32>
    %cst_89 = arith.constant dense<0.000000e+00> : vector<16xf32>
    %148 = vector.multi_reduction <add>, %147, %cst_89 [1] : vector<16x16xf32> to vector<16xf32>
    %149 = vector.shape_cast %148 : vector<16xf32> to vector<16x1xf32>
    %150 = tpu.reciprocal %149 {approx = true} : vector<16x1xf32> -> vector<16x1xf32>
    %151 = vector.broadcast %0 : f32 to vector<16x1xf32>
    %152 = arith.mulf %151, %150 : vector<16x1xf32>
    %153 = vector.broadcast %152 : vector<16x1xf32> to vector<16x16xf32>
    %154 = arith.mulf %147, %153 : vector<16x16xf32>
    %155 = arith.addf %154, %141 : vector<16x16xf32>
    %c0_90 = arith.constant 0 : index
    %c1_91 = arith.constant 1 : index
    %c0_92 = arith.constant 0 : index
    %c0_93 = arith.constant 0 : index
    %156 = vector.load %arg11[%c0_90, %c1_91, %c0_92, %c0_93] : memref<2x4x16x16xf32, #tpu.memory_space<vmem>>, vector<1x1x16x16xf32>
    %157 = vector.shape_cast %156 : vector<1x1x16x16xf32> to vector<16x16xf32>
    %158 = vector.shape_cast %155 : vector<16x16xf32> to vector<1x1x16x16xf32>
    tpu.vector_store %arg11[%c0_90, %c1_91, %c0_92, %c0_93], %158 {strides = array<i32>} : memref<2x4x16x16xf32, #tpu.memory_space<vmem>>, vector<1x1x16x16xf32>,
    %c2_94 = arith.constant 2 : index
    %159 = memref.load %arg5[%c2_94] : memref<4xf32, #tpu.memory_space<smem>>
    %c2_95 = arith.constant 2 : index
    %160 = memref.load %arg7[%c2_95] : memref<4xf32, #tpu.memory_space<smem>>
    %c2_96 = arith.constant 2 : index
    %161 = memref.load %arg9[%c2_96] : memref<4xf32, #tpu.memory_space<smem>>
    %c2_97 = arith.constant 2 : index
    %c0_98 = arith.constant 0 : index
    %162 = memref.load %arg4[%c2_97, %c0_98] : memref<4x4xf32, #tpu.memory_space<smem>>
    %163 = vector.broadcast %162 : f32 to vector<16x16xf32>
    %164 = arith.mulf %163, %2 : vector<16x16xf32>
    %165 = vector.broadcast %159 : f32 to vector<16x16xf32>
    %166 = arith.addf %165, %164 : vector<16x16xf32>
    %c2_99 = arith.constant 2 : index
    %c0_100 = arith.constant 0 : index
    %167 = memref.load %arg6[%c2_99, %c0_100] : memref<4x4xf32, #tpu.memory_space<smem>>
    %168 = vector.broadcast %167 : f32 to vector<16x16xf32>
    %169 = arith.mulf %168, %2 : vector<16x16xf32>
    %170 = vector.broadcast %160 : f32 to vector<16x16xf32>
    %171 = arith.addf %170, %169 : vector<16x16xf32>
    %c2_101 = arith.constant 2 : index
    %c0_102 = arith.constant 0 : index
    %172 = memref.load %arg8[%c2_101, %c0_102] : memref<4x4xf32, #tpu.memory_space<smem>>
    %173 = vector.broadcast %172 : f32 to vector<16x16xf32>
    %174 = arith.mulf %173, %10 : vector<16x16xf32>
    %175 = vector.broadcast %161 : f32 to vector<16x16xf32>
    %176 = arith.addf %175, %174 : vector<16x16xf32>
    %c2_103 = arith.constant 2 : index
    %c1_104 = arith.constant 1 : index
    %177 = memref.load %arg4[%c2_103, %c1_104] : memref<4x4xf32, #tpu.memory_space<smem>>
    %178 = vector.broadcast %177 : f32 to vector<16x16xf32>
    %179 = arith.mulf %178, %4 : vector<16x16xf32>
    %180 = arith.addf %166, %179 : vector<16x16xf32>
    %c2_105 = arith.constant 2 : index
    %c1_106 = arith.constant 1 : index
    %181 = memref.load %arg6[%c2_105, %c1_106] : memref<4x4xf32, #tpu.memory_space<smem>>
    %182 = vector.broadcast %181 : f32 to vector<16x16xf32>
    %183 = arith.mulf %182, %4 : vector<16x16xf32>
    %184 = arith.addf %171, %183 : vector<16x16xf32>
    %c2_107 = arith.constant 2 : index
    %c1_108 = arith.constant 1 : index
    %185 = memref.load %arg8[%c2_107, %c1_108] : memref<4x4xf32, #tpu.memory_space<smem>>
    %186 = vector.broadcast %185 : f32 to vector<16x16xf32>
    %187 = arith.mulf %186, %12 : vector<16x16xf32>
    %188 = arith.addf %176, %187 : vector<16x16xf32>
    %c2_109 = arith.constant 2 : index
    %c2_110 = arith.constant 2 : index
    %189 = memref.load %arg4[%c2_109, %c2_110] : memref<4x4xf32, #tpu.memory_space<smem>>
    %190 = vector.broadcast %189 : f32 to vector<16x16xf32>
    %191 = arith.mulf %190, %6 : vector<16x16xf32>
    %192 = arith.addf %180, %191 : vector<16x16xf32>
    %c2_111 = arith.constant 2 : index
    %c2_112 = arith.constant 2 : index
    %193 = memref.load %arg6[%c2_111, %c2_112] : memref<4x4xf32, #tpu.memory_space<smem>>
    %194 = vector.broadcast %193 : f32 to vector<16x16xf32>
    %195 = arith.mulf %194, %6 : vector<16x16xf32>
    %196 = arith.addf %184, %195 : vector<16x16xf32>
    %c2_113 = arith.constant 2 : index
    %c2_114 = arith.constant 2 : index
    %197 = memref.load %arg8[%c2_113, %c2_114] : memref<4x4xf32, #tpu.memory_space<smem>>
    %198 = vector.broadcast %197 : f32 to vector<16x16xf32>
    %199 = arith.mulf %198, %14 : vector<16x16xf32>
    %200 = arith.addf %188, %199 : vector<16x16xf32>
    %c2_115 = arith.constant 2 : index
    %c3_116 = arith.constant 3 : index
    %201 = memref.load %arg4[%c2_115, %c3_116] : memref<4x4xf32, #tpu.memory_space<smem>>
    %202 = vector.broadcast %201 : f32 to vector<16x16xf32>
    %203 = arith.mulf %202, %8 : vector<16x16xf32>
    %204 = arith.addf %192, %203 : vector<16x16xf32>
    %c2_117 = arith.constant 2 : index
    %c3_118 = arith.constant 3 : index
    %205 = memref.load %arg6[%c2_117, %c3_118] : memref<4x4xf32, #tpu.memory_space<smem>>
    %206 = vector.broadcast %205 : f32 to vector<16x16xf32>
    %207 = arith.mulf %206, %8 : vector<16x16xf32>
    %208 = arith.addf %196, %207 : vector<16x16xf32>
    %c2_119 = arith.constant 2 : index
    %c3_120 = arith.constant 3 : index
    %209 = memref.load %arg8[%c2_119, %c3_120] : memref<4x4xf32, #tpu.memory_space<smem>>
    %210 = vector.broadcast %209 : f32 to vector<16x16xf32>
    %211 = arith.mulf %210, %16 : vector<16x16xf32>
    %212 = arith.addf %200, %211 : vector<16x16xf32>
    %213 = arith.mulf %204, %208 : vector<16x16xf32>
    %cst_121 = arith.constant dense<0xFF800000> : vector<16xf32>
    %214 = vector.multi_reduction <maximumf>, %213, %cst_121 [1] : vector<16x16xf32> to vector<16xf32>
    %215 = vector.shape_cast %214 : vector<16xf32> to vector<16x1xf32>
    %216 = vector.broadcast %215 : vector<16x1xf32> to vector<16x16xf32>
    %217 = arith.subf %213, %216 : vector<16x16xf32>
    %218 = math.exp %217 : vector<16x16xf32>
    %cst_122 = arith.constant dense<0.000000e+00> : vector<16xf32>
    %219 = vector.multi_reduction <add>, %218, %cst_122 [1] : vector<16x16xf32> to vector<16xf32>
    %220 = vector.shape_cast %219 : vector<16xf32> to vector<16x1xf32>
    %221 = tpu.reciprocal %220 {approx = true} : vector<16x1xf32> -> vector<16x1xf32>
    %222 = vector.broadcast %0 : f32 to vector<16x1xf32>
    %223 = arith.mulf %222, %221 : vector<16x1xf32>
    %224 = vector.broadcast %223 : vector<16x1xf32> to vector<16x16xf32>
    %225 = arith.mulf %218, %224 : vector<16x16xf32>
    %226 = arith.addf %225, %212 : vector<16x16xf32>
    %c0_123 = arith.constant 0 : index
    %c2_124 = arith.constant 2 : index
    %c0_125 = arith.constant 0 : index
    %c0_126 = arith.constant 0 : index
    %227 = vector.load %arg11[%c0_123, %c2_124, %c0_125, %c0_126] : memref<2x4x16x16xf32, #tpu.memory_space<vmem>>, vector<1x1x16x16xf32>
    %228 = vector.shape_cast %227 : vector<1x1x16x16xf32> to vector<16x16xf32>
    %229 = vector.shape_cast %226 : vector<16x16xf32> to vector<1x1x16x16xf32>
    tpu.vector_store %arg11[%c0_123, %c2_124, %c0_125, %c0_126], %229 {strides = array<i32>} : memref<2x4x16x16xf32, #tpu.memory_space<vmem>>, vector<1x1x16x16xf32>,
    %c3_127 = arith.constant 3 : index
    %230 = memref.load %arg5[%c3_127] : memref<4xf32, #tpu.memory_space<smem>>
    %c3_128 = arith.constant 3 : index
    %231 = memref.load %arg7[%c3_128] : memref<4xf32, #tpu.memory_space<smem>>
    %c3_129 = arith.constant 3 : index
    %232 = memref.load %arg9[%c3_129] : memref<4xf32, #tpu.memory_space<smem>>
    %c3_130 = arith.constant 3 : index
    %c0_131 = arith.constant 0 : index
    %233 = memref.load %arg4[%c3_130, %c0_131] : memref<4x4xf32, #tpu.memory_space<smem>>
    %234 = vector.broadcast %233 : f32 to vector<16x16xf32>
    %235 = arith.mulf %234, %2 : vector<16x16xf32>
    %236 = vector.broadcast %230 : f32 to vector<16x16xf32>
    %237 = arith.addf %236, %235 : vector<16x16xf32>
    %c3_132 = arith.constant 3 : index
    %c0_133 = arith.constant 0 : index
    %238 = memref.load %arg6[%c3_132, %c0_133] : memref<4x4xf32, #tpu.memory_space<smem>>
    %239 = vector.broadcast %238 : f32 to vector<16x16xf32>
    %240 = arith.mulf %239, %2 : vector<16x16xf32>
    %241 = vector.broadcast %231 : f32 to vector<16x16xf32>
    %242 = arith.addf %241, %240 : vector<16x16xf32>
    %c3_134 = arith.constant 3 : index
    %c0_135 = arith.constant 0 : index
    %243 = memref.load %arg8[%c3_134, %c0_135] : memref<4x4xf32, #tpu.memory_space<smem>>
    %244 = vector.broadcast %243 : f32 to vector<16x16xf32>
    %245 = arith.mulf %244, %10 : vector<16x16xf32>
    %246 = vector.broadcast %232 : f32 to vector<16x16xf32>
    %247 = arith.addf %246, %245 : vector<16x16xf32>
    %c3_136 = arith.constant 3 : index
    %c1_137 = arith.constant 1 : index
    %248 = memref.load %arg4[%c3_136, %c1_137] : memref<4x4xf32, #tpu.memory_space<smem>>
    %249 = vector.broadcast %248 : f32 to vector<16x16xf32>
    %250 = arith.mulf %249, %4 : vector<16x16xf32>
    %251 = arith.addf %237, %250 : vector<16x16xf32>
    %c3_138 = arith.constant 3 : index
    %c1_139 = arith.constant 1 : index
    %252 = memref.load %arg6[%c3_138, %c1_139] : memref<4x4xf32, #tpu.memory_space<smem>>
    %253 = vector.broadcast %252 : f32 to vector<16x16xf32>
    %254 = arith.mulf %253, %4 : vector<16x16xf32>
    %255 = arith.addf %242, %254 : vector<16x16xf32>
    %c3_140 = arith.constant 3 : index
    %c1_141 = arith.constant 1 : index
    %256 = memref.load %arg8[%c3_140, %c1_141] : memref<4x4xf32, #tpu.memory_space<smem>>
    %257 = vector.broadcast %256 : f32 to vector<16x16xf32>
    %258 = arith.mulf %257, %12 : vector<16x16xf32>
    %259 = arith.addf %247, %258 : vector<16x16xf32>
    %c3_142 = arith.constant 3 : index
    %c2_143 = arith.constant 2 : index
    %260 = memref.load %arg4[%c3_142, %c2_143] : memref<4x4xf32, #tpu.memory_space<smem>>
    %261 = vector.broadcast %260 : f32 to vector<16x16xf32>
    %262 = arith.mulf %261, %6 : vector<16x16xf32>
    %263 = arith.addf %251, %262 : vector<16x16xf32>
    %c3_144 = arith.constant 3 : index
    %c2_145 = arith.constant 2 : index
    %264 = memref.load %arg6[%c3_144, %c2_145] : memref<4x4xf32, #tpu.memory_space<smem>>
    %265 = vector.broadcast %264 : f32 to vector<16x16xf32>
    %266 = arith.mulf %265, %6 : vector<16x16xf32>
    %267 = arith.addf %255, %266 : vector<16x16xf32>
    %c3_146 = arith.constant 3 : index
    %c2_147 = arith.constant 2 : index
    %268 = memref.load %arg8[%c3_146, %c2_147] : memref<4x4xf32, #tpu.memory_space<smem>>
    %269 = vector.broadcast %268 : f32 to vector<16x16xf32>
    %270 = arith.mulf %269, %14 : vector<16x16xf32>
    %271 = arith.addf %259, %270 : vector<16x16xf32>
    %c3_148 = arith.constant 3 : index
    %c3_149 = arith.constant 3 : index
    %272 = memref.load %arg4[%c3_148, %c3_149] : memref<4x4xf32, #tpu.memory_space<smem>>
    %273 = vector.broadcast %272 : f32 to vector<16x16xf32>
    %274 = arith.mulf %273, %8 : vector<16x16xf32>
    %275 = arith.addf %263, %274 : vector<16x16xf32>
    %c3_150 = arith.constant 3 : index
    %c3_151 = arith.constant 3 : index
    %276 = memref.load %arg6[%c3_150, %c3_151] : memref<4x4xf32, #tpu.memory_space<smem>>
    %277 = vector.broadcast %276 : f32 to vector<16x16xf32>
    %278 = arith.mulf %277, %8 : vector<16x16xf32>
    %279 = arith.addf %267, %278 : vector<16x16xf32>
    %c3_152 = arith.constant 3 : index
    %c3_153 = arith.constant 3 : index
    %280 = memref.load %arg8[%c3_152, %c3_153] : memref<4x4xf32, #tpu.memory_space<smem>>
    %281 = vector.broadcast %280 : f32 to vector<16x16xf32>
    %282 = arith.mulf %281, %16 : vector<16x16xf32>
    %283 = arith.addf %271, %282 : vector<16x16xf32>
    %284 = arith.mulf %275, %279 : vector<16x16xf32>
    %cst_154 = arith.constant dense<0xFF800000> : vector<16xf32>
    %285 = vector.multi_reduction <maximumf>, %284, %cst_154 [1] : vector<16x16xf32> to vector<16xf32>
    %286 = vector.shape_cast %285 : vector<16xf32> to vector<16x1xf32>
    %287 = vector.broadcast %286 : vector<16x1xf32> to vector<16x16xf32>
    %288 = arith.subf %284, %287 : vector<16x16xf32>
    %289 = math.exp %288 : vector<16x16xf32>
    %cst_155 = arith.constant dense<0.000000e+00> : vector<16xf32>
    %290 = vector.multi_reduction <add>, %289, %cst_155 [1] : vector<16x16xf32> to vector<16xf32>
    %291 = vector.shape_cast %290 : vector<16xf32> to vector<16x1xf32>
    %292 = tpu.reciprocal %291 {approx = true} : vector<16x1xf32> -> vector<16x1xf32>
    %293 = vector.broadcast %0 : f32 to vector<16x1xf32>
    %294 = arith.mulf %293, %292 : vector<16x1xf32>
    %295 = vector.broadcast %294 : vector<16x1xf32> to vector<16x16xf32>
    %296 = arith.mulf %289, %295 : vector<16x16xf32>
    %297 = arith.addf %296, %283 : vector<16x16xf32>
    %c0_156 = arith.constant 0 : index
    %c3_157 = arith.constant 3 : index
    %c0_158 = arith.constant 0 : index
    %c0_159 = arith.constant 0 : index
    %298 = vector.load %arg11[%c0_156, %c3_157, %c0_158, %c0_159] : memref<2x4x16x16xf32, #tpu.memory_space<vmem>>, vector<1x1x16x16xf32>
    %299 = vector.shape_cast %298 : vector<1x1x16x16xf32> to vector<16x16xf32>
    %300 = vector.shape_cast %297 : vector<16x16xf32> to vector<1x1x16x16xf32>
    tpu.vector_store %arg11[%c0_156, %c3_157, %c0_158, %c0_159], %300 {strides = array<i32>} : memref<2x4x16x16xf32, #tpu.memory_space<vmem>>, vector<1x1x16x16xf32>,
    %c1_160 = arith.constant 1 : index
    %c0_161 = arith.constant 0 : index
    %c0_162 = arith.constant 0 : index
    %c0_163 = arith.constant 0 : index
    %301 = vector.load %arg3[%c1_160, %c0_161, %c0_162, %c0_163] : memref<2x4x16x16xf32, #tpu.memory_space<vmem>>, vector<1x1x16x16xf32>
    %302 = vector.shape_cast %301 : vector<1x1x16x16xf32> to vector<16x16xf32>
    %c1_164 = arith.constant 1 : index
    %c1_165 = arith.constant 1 : index
    %c0_166 = arith.constant 0 : index
    %c0_167 = arith.constant 0 : index
    %303 = vector.load %arg3[%c1_164, %c1_165, %c0_166, %c0_167] : memref<2x4x16x16xf32, #tpu.memory_space<vmem>>, vector<1x1x16x16xf32>
    %304 = vector.shape_cast %303 : vector<1x1x16x16xf32> to vector<16x16xf32>
    %c1_168 = arith.constant 1 : index
    %c2_169 = arith.constant 2 : index
    %c0_170 = arith.constant 0 : index
    %c0_171 = arith.constant 0 : index
    %305 = vector.load %arg3[%c1_168, %c2_169, %c0_170, %c0_171] : memref<2x4x16x16xf32, #tpu.memory_space<vmem>>, vector<1x1x16x16xf32>
    %306 = vector.shape_cast %305 : vector<1x1x16x16xf32> to vector<16x16xf32>
    %c1_172 = arith.constant 1 : index
    %c3_173 = arith.constant 3 : index
    %c0_174 = arith.constant 0 : index
    %c0_175 = arith.constant 0 : index
    %307 = vector.load %arg3[%c1_172, %c3_173, %c0_174, %c0_175] : memref<2x4x16x16xf32, #tpu.memory_space<vmem>>, vector<1x1x16x16xf32>
    %308 = vector.shape_cast %307 : vector<1x1x16x16xf32> to vector<16x16xf32>
    %c1_176 = arith.constant 1 : index
    %c0_177 = arith.constant 0 : index
    %c0_178 = arith.constant 0 : index
    %c0_179 = arith.constant 0 : index
    %309 = vector.load %arg2[%c1_176, %c0_177, %c0_178, %c0_179] : memref<2x4x16x16xf32, #tpu.memory_space<vmem>>, vector<1x1x16x16xf32>
    %310 = vector.shape_cast %309 : vector<1x1x16x16xf32> to vector<16x16xf32>
    %c1_180 = arith.constant 1 : index
    %c1_181 = arith.constant 1 : index
    %c0_182 = arith.constant 0 : index
    %c0_183 = arith.constant 0 : index
    %311 = vector.load %arg2[%c1_180, %c1_181, %c0_182, %c0_183] : memref<2x4x16x16xf32, #tpu.memory_space<vmem>>, vector<1x1x16x16xf32>
    %312 = vector.shape_cast %311 : vector<1x1x16x16xf32> to vector<16x16xf32>
    %c1_184 = arith.constant 1 : index
    %c2_185 = arith.constant 2 : index
    %c0_186 = arith.constant 0 : index
    %c0_187 = arith.constant 0 : index
    %313 = vector.load %arg2[%c1_184, %c2_185, %c0_186, %c0_187] : memref<2x4x16x16xf32, #tpu.memory_space<vmem>>, vector<1x1x16x16xf32>
    %314 = vector.shape_cast %313 : vector<1x1x16x16xf32> to vector<16x16xf32>
    %c1_188 = arith.constant 1 : index
    %c3_189 = arith.constant 3 : index
    %c0_190 = arith.constant 0 : index
    %c0_191 = arith.constant 0 : index
    %315 = vector.load %arg2[%c1_188, %c3_189, %c0_190, %c0_191] : memref<2x4x16x16xf32, #tpu.memory_space<vmem>>, vector<1x1x16x16xf32>
    %316 = vector.shape_cast %315 : vector<1x1x16x16xf32> to vector<16x16xf32>
    %c0_192 = arith.constant 0 : index
    %317 = memref.load %arg5[%c0_192] : memref<4xf32, #tpu.memory_space<smem>>
    %c0_193 = arith.constant 0 : index
    %318 = memref.load %arg7[%c0_193] : memref<4xf32, #tpu.memory_space<smem>>
    %c0_194 = arith.constant 0 : index
    %319 = memref.load %arg9[%c0_194] : memref<4xf32, #tpu.memory_space<smem>>
    %c0_195 = arith.constant 0 : index
    %c0_196 = arith.constant 0 : index
    %320 = memref.load %arg4[%c0_195, %c0_196] : memref<4x4xf32, #tpu.memory_space<smem>>
    %321 = vector.broadcast %320 : f32 to vector<16x16xf32>
    %322 = arith.mulf %321, %302 : vector<16x16xf32>
    %323 = vector.broadcast %317 : f32 to vector<16x16xf32>
    %324 = arith.addf %323, %322 : vector<16x16xf32>
    %c0_197 = arith.constant 0 : index
    %c0_198 = arith.constant 0 : index
    %325 = memref.load %arg6[%c0_197, %c0_198] : memref<4x4xf32, #tpu.memory_space<smem>>
    %326 = vector.broadcast %325 : f32 to vector<16x16xf32>
    %327 = arith.mulf %326, %302 : vector<16x16xf32>
    %328 = vector.broadcast %318 : f32 to vector<16x16xf32>
    %329 = arith.addf %328, %327 : vector<16x16xf32>
    %c0_199 = arith.constant 0 : index
    %c0_200 = arith.constant 0 : index
    %330 = memref.load %arg8[%c0_199, %c0_200] : memref<4x4xf32, #tpu.memory_space<smem>>
    %331 = vector.broadcast %330 : f32 to vector<16x16xf32>
    %332 = arith.mulf %331, %310 : vector<16x16xf32>
    %333 = vector.broadcast %319 : f32 to vector<16x16xf32>
    %334 = arith.addf %333, %332 : vector<16x16xf32>
    %c0_201 = arith.constant 0 : index
    %c1_202 = arith.constant 1 : index
    %335 = memref.load %arg4[%c0_201, %c1_202] : memref<4x4xf32, #tpu.memory_space<smem>>
    %336 = vector.broadcast %335 : f32 to vector<16x16xf32>
    %337 = arith.mulf %336, %304 : vector<16x16xf32>
    %338 = arith.addf %324, %337 : vector<16x16xf32>
    %c0_203 = arith.constant 0 : index
    %c1_204 = arith.constant 1 : index
    %339 = memref.load %arg6[%c0_203, %c1_204] : memref<4x4xf32, #tpu.memory_space<smem>>
    %340 = vector.broadcast %339 : f32 to vector<16x16xf32>
    %341 = arith.mulf %340, %304 : vector<16x16xf32>
    %342 = arith.addf %329, %341 : vector<16x16xf32>
    %c0_205 = arith.constant 0 : index
    %c1_206 = arith.constant 1 : index
    %343 = memref.load %arg8[%c0_205, %c1_206] : memref<4x4xf32, #tpu.memory_space<smem>>
    %344 = vector.broadcast %343 : f32 to vector<16x16xf32>
    %345 = arith.mulf %344, %312 : vector<16x16xf32>
    %346 = arith.addf %334, %345 : vector<16x16xf32>
    %c0_207 = arith.constant 0 : index
    %c2_208 = arith.constant 2 : index
    %347 = memref.load %arg4[%c0_207, %c2_208] : memref<4x4xf32, #tpu.memory_space<smem>>
    %348 = vector.broadcast %347 : f32 to vector<16x16xf32>
    %349 = arith.mulf %348, %306 : vector<16x16xf32>
    %350 = arith.addf %338, %349 : vector<16x16xf32>
    %c0_209 = arith.constant 0 : index
    %c2_210 = arith.constant 2 : index
    %351 = memref.load %arg6[%c0_209, %c2_210] : memref<4x4xf32, #tpu.memory_space<smem>>
    %352 = vector.broadcast %351 : f32 to vector<16x16xf32>
    %353 = arith.mulf %352, %306 : vector<16x16xf32>
    %354 = arith.addf %342, %353 : vector<16x16xf32>
    %c0_211 = arith.constant 0 : index
    %c2_212 = arith.constant 2 : index
    %355 = memref.load %arg8[%c0_211, %c2_212] : memref<4x4xf32, #tpu.memory_space<smem>>
    %356 = vector.broadcast %355 : f32 to vector<16x16xf32>
    %357 = arith.mulf %356, %314 : vector<16x16xf32>
    %358 = arith.addf %346, %357 : vector<16x16xf32>
    %c0_213 = arith.constant 0 : index
    %c3_214 = arith.constant 3 : index
    %359 = memref.load %arg4[%c0_213, %c3_214] : memref<4x4xf32, #tpu.memory_space<smem>>
    %360 = vector.broadcast %359 : f32 to vector<16x16xf32>
    %361 = arith.mulf %360, %308 : vector<16x16xf32>
    %362 = arith.addf %350, %361 : vector<16x16xf32>
    %c0_215 = arith.constant 0 : index
    %c3_216 = arith.constant 3 : index
    %363 = memref.load %arg6[%c0_215, %c3_216] : memref<4x4xf32, #tpu.memory_space<smem>>
    %364 = vector.broadcast %363 : f32 to vector<16x16xf32>
    %365 = arith.mulf %364, %308 : vector<16x16xf32>
    %366 = arith.addf %354, %365 : vector<16x16xf32>
    %c0_217 = arith.constant 0 : index
    %c3_218 = arith.constant 3 : index
    %367 = memref.load %arg8[%c0_217, %c3_218] : memref<4x4xf32, #tpu.memory_space<smem>>
    %368 = vector.broadcast %367 : f32 to vector<16x16xf32>
    %369 = arith.mulf %368, %316 : vector<16x16xf32>
    %370 = arith.addf %358, %369 : vector<16x16xf32>
    %371 = arith.mulf %362, %366 : vector<16x16xf32>
    %cst_219 = arith.constant dense<0xFF800000> : vector<16xf32>
    %372 = vector.multi_reduction <maximumf>, %371, %cst_219 [1] : vector<16x16xf32> to vector<16xf32>
    %373 = vector.shape_cast %372 : vector<16xf32> to vector<16x1xf32>
    %374 = vector.broadcast %373 : vector<16x1xf32> to vector<16x16xf32>
    %375 = arith.subf %371, %374 : vector<16x16xf32>
    %376 = math.exp %375 : vector<16x16xf32>
    %cst_220 = arith.constant dense<0.000000e+00> : vector<16xf32>
    %377 = vector.multi_reduction <add>, %376, %cst_220 [1] : vector<16x16xf32> to vector<16xf32>
    %378 = vector.shape_cast %377 : vector<16xf32> to vector<16x1xf32>
    %379 = tpu.reciprocal %378 {approx = true} : vector<16x1xf32> -> vector<16x1xf32>
    %380 = vector.broadcast %0 : f32 to vector<16x1xf32>
    %381 = arith.mulf %380, %379 : vector<16x1xf32>
    %382 = vector.broadcast %381 : vector<16x1xf32> to vector<16x16xf32>
    %383 = arith.mulf %376, %382 : vector<16x16xf32>
    %384 = arith.addf %383, %370 : vector<16x16xf32>
    %c1_221 = arith.constant 1 : index
    %c0_222 = arith.constant 0 : index
    %c0_223 = arith.constant 0 : index
    %c0_224 = arith.constant 0 : index
    %385 = vector.load %arg11[%c1_221, %c0_222, %c0_223, %c0_224] : memref<2x4x16x16xf32, #tpu.memory_space<vmem>>, vector<1x1x16x16xf32>
    %386 = vector.shape_cast %385 : vector<1x1x16x16xf32> to vector<16x16xf32>
    %387 = vector.shape_cast %384 : vector<16x16xf32> to vector<1x1x16x16xf32>
    tpu.vector_store %arg11[%c1_221, %c0_222, %c0_223, %c0_224], %387 {strides = array<i32>} : memref<2x4x16x16xf32, #tpu.memory_space<vmem>>, vector<1x1x16x16xf32>,
    %c1_225 = arith.constant 1 : index
    %388 = memref.load %arg5[%c1_225] : memref<4xf32, #tpu.memory_space<smem>>
    %c1_226 = arith.constant 1 : index
    %389 = memref.load %arg7[%c1_226] : memref<4xf32, #tpu.memory_space<smem>>
    %c1_227 = arith.constant 1 : index
    %390 = memref.load %arg9[%c1_227] : memref<4xf32, #tpu.memory_space<smem>>
    %c1_228 = arith.constant 1 : index
    %c0_229 = arith.constant 0 : index
    %391 = memref.load %arg4[%c1_228, %c0_229] : memref<4x4xf32, #tpu.memory_space<smem>>
    %392 = vector.broadcast %391 : f32 to vector<16x16xf32>
    %393 = arith.mulf %392, %302 : vector<16x16xf32>
    %394 = vector.broadcast %388 : f32 to vector<16x16xf32>
    %395 = arith.addf %394, %393 : vector<16x16xf32>
    %c1_230 = arith.constant 1 : index
    %c0_231 = arith.constant 0 : index
    %396 = memref.load %arg6[%c1_230, %c0_231] : memref<4x4xf32, #tpu.memory_space<smem>>
    %397 = vector.broadcast %396 : f32 to vector<16x16xf32>
    %398 = arith.mulf %397, %302 : vector<16x16xf32>
    %399 = vector.broadcast %389 : f32 to vector<16x16xf32>
    %400 = arith.addf %399, %398 : vector<16x16xf32>
    %c1_232 = arith.constant 1 : index
    %c0_233 = arith.constant 0 : index
    %401 = memref.load %arg8[%c1_232, %c0_233] : memref<4x4xf32, #tpu.memory_space<smem>>
    %402 = vector.broadcast %401 : f32 to vector<16x16xf32>
    %403 = arith.mulf %402, %310 : vector<16x16xf32>
    %404 = vector.broadcast %390 : f32 to vector<16x16xf32>
    %405 = arith.addf %404, %403 : vector<16x16xf32>
    %c1_234 = arith.constant 1 : index
    %c1_235 = arith.constant 1 : index
    %406 = memref.load %arg4[%c1_234, %c1_235] : memref<4x4xf32, #tpu.memory_space<smem>>
    %407 = vector.broadcast %406 : f32 to vector<16x16xf32>
    %408 = arith.mulf %407, %304 : vector<16x16xf32>
    %409 = arith.addf %395, %408 : vector<16x16xf32>
    %c1_236 = arith.constant 1 : index
    %c1_237 = arith.constant 1 : index
    %410 = memref.load %arg6[%c1_236, %c1_237] : memref<4x4xf32, #tpu.memory_space<smem>>
    %411 = vector.broadcast %410 : f32 to vector<16x16xf32>
    %412 = arith.mulf %411, %304 : vector<16x16xf32>
    %413 = arith.addf %400, %412 : vector<16x16xf32>
    %c1_238 = arith.constant 1 : index
    %c1_239 = arith.constant 1 : index
    %414 = memref.load %arg8[%c1_238, %c1_239] : memref<4x4xf32, #tpu.memory_space<smem>>
    %415 = vector.broadcast %414 : f32 to vector<16x16xf32>
    %416 = arith.mulf %415, %312 : vector<16x16xf32>
    %417 = arith.addf %405, %416 : vector<16x16xf32>
    %c1_240 = arith.constant 1 : index
    %c2_241 = arith.constant 2 : index
    %418 = memref.load %arg4[%c1_240, %c2_241] : memref<4x4xf32, #tpu.memory_space<smem>>
    %419 = vector.broadcast %418 : f32 to vector<16x16xf32>
    %420 = arith.mulf %419, %306 : vector<16x16xf32>
    %421 = arith.addf %409, %420 : vector<16x16xf32>
    %c1_242 = arith.constant 1 : index
    %c2_243 = arith.constant 2 : index
    %422 = memref.load %arg6[%c1_242, %c2_243] : memref<4x4xf32, #tpu.memory_space<smem>>
    %423 = vector.broadcast %422 : f32 to vector<16x16xf32>
    %424 = arith.mulf %423, %306 : vector<16x16xf32>
    %425 = arith.addf %413, %424 : vector<16x16xf32>
    %c1_244 = arith.constant 1 : index
    %c2_245 = arith.constant 2 : index
    %426 = memref.load %arg8[%c1_244, %c2_245] : memref<4x4xf32, #tpu.memory_space<smem>>
    %427 = vector.broadcast %426 : f32 to vector<16x16xf32>
    %428 = arith.mulf %427, %314 : vector<16x16xf32>
    %429 = arith.addf %417, %428 : vector<16x16xf32>
    %c1_246 = arith.constant 1 : index
    %c3_247 = arith.constant 3 : index
    %430 = memref.load %arg4[%c1_246, %c3_247] : memref<4x4xf32, #tpu.memory_space<smem>>
    %431 = vector.broadcast %430 : f32 to vector<16x16xf32>
    %432 = arith.mulf %431, %308 : vector<16x16xf32>
    %433 = arith.addf %421, %432 : vector<16x16xf32>
    %c1_248 = arith.constant 1 : index
    %c3_249 = arith.constant 3 : index
    %434 = memref.load %arg6[%c1_248, %c3_249] : memref<4x4xf32, #tpu.memory_space<smem>>
    %435 = vector.broadcast %434 : f32 to vector<16x16xf32>
    %436 = arith.mulf %435, %308 : vector<16x16xf32>
    %437 = arith.addf %425, %436 : vector<16x16xf32>
    %c1_250 = arith.constant 1 : index
    %c3_251 = arith.constant 3 : index
    %438 = memref.load %arg8[%c1_250, %c3_251] : memref<4x4xf32, #tpu.memory_space<smem>>
    %439 = vector.broadcast %438 : f32 to vector<16x16xf32>
    %440 = arith.mulf %439, %316 : vector<16x16xf32>
    %441 = arith.addf %429, %440 : vector<16x16xf32>
    %442 = arith.mulf %433, %437 : vector<16x16xf32>
    %cst_252 = arith.constant dense<0xFF800000> : vector<16xf32>
    %443 = vector.multi_reduction <maximumf>, %442, %cst_252 [1] : vector<16x16xf32> to vector<16xf32>
    %444 = vector.shape_cast %443 : vector<16xf32> to vector<16x1xf32>
    %445 = vector.broadcast %444 : vector<16x1xf32> to vector<16x16xf32>
    %446 = arith.subf %442, %445 : vector<16x16xf32>
    %447 = math.exp %446 : vector<16x16xf32>
    %cst_253 = arith.constant dense<0.000000e+00> : vector<16xf32>
    %448 = vector.multi_reduction <add>, %447, %cst_253 [1] : vector<16x16xf32> to vector<16xf32>
    %449 = vector.shape_cast %448 : vector<16xf32> to vector<16x1xf32>
    %450 = tpu.reciprocal %449 {approx = true} : vector<16x1xf32> -> vector<16x1xf32>
    %451 = vector.broadcast %0 : f32 to vector<16x1xf32>
    %452 = arith.mulf %451, %450 : vector<16x1xf32>
    %453 = vector.broadcast %452 : vector<16x1xf32> to vector<16x16xf32>
    %454 = arith.mulf %447, %453 : vector<16x16xf32>
    %455 = arith.addf %454, %441 : vector<16x16xf32>
    %c1_254 = arith.constant 1 : index
    %c1_255 = arith.constant 1 : index
    %c0_256 = arith.constant 0 : index
    %c0_257 = arith.constant 0 : index
    %456 = vector.load %arg11[%c1_254, %c1_255, %c0_256, %c0_257] : memref<2x4x16x16xf32, #tpu.memory_space<vmem>>, vector<1x1x16x16xf32>
    %457 = vector.shape_cast %456 : vector<1x1x16x16xf32> to vector<16x16xf32>
    %458 = vector.shape_cast %455 : vector<16x16xf32> to vector<1x1x16x16xf32>
    tpu.vector_store %arg11[%c1_254, %c1_255, %c0_256, %c0_257], %458 {strides = array<i32>} : memref<2x4x16x16xf32, #tpu.memory_space<vmem>>, vector<1x1x16x16xf32>,
    %c2_258 = arith.constant 2 : index
    %459 = memref.load %arg5[%c2_258] : memref<4xf32, #tpu.memory_space<smem>>
    %c2_259 = arith.constant 2 : index
    %460 = memref.load %arg7[%c2_259] : memref<4xf32, #tpu.memory_space<smem>>
    %c2_260 = arith.constant 2 : index
    %461 = memref.load %arg9[%c2_260] : memref<4xf32, #tpu.memory_space<smem>>
    %c2_261 = arith.constant 2 : index
    %c0_262 = arith.constant 0 : index
    %462 = memref.load %arg4[%c2_261, %c0_262] : memref<4x4xf32, #tpu.memory_space<smem>>
    %463 = vector.broadcast %462 : f32 to vector<16x16xf32>
    %464 = arith.mulf %463, %302 : vector<16x16xf32>
    %465 = vector.broadcast %459 : f32 to vector<16x16xf32>
    %466 = arith.addf %465, %464 : vector<16x16xf32>
    %c2_263 = arith.constant 2 : index
    %c0_264 = arith.constant 0 : index
    %467 = memref.load %arg6[%c2_263, %c0_264] : memref<4x4xf32, #tpu.memory_space<smem>>
    %468 = vector.broadcast %467 : f32 to vector<16x16xf32>
    %469 = arith.mulf %468, %302 : vector<16x16xf32>
    %470 = vector.broadcast %460 : f32 to vector<16x16xf32>
    %471 = arith.addf %470, %469 : vector<16x16xf32>
    %c2_265 = arith.constant 2 : index
    %c0_266 = arith.constant 0 : index
    %472 = memref.load %arg8[%c2_265, %c0_266] : memref<4x4xf32, #tpu.memory_space<smem>>
    %473 = vector.broadcast %472 : f32 to vector<16x16xf32>
    %474 = arith.mulf %473, %310 : vector<16x16xf32>
    %475 = vector.broadcast %461 : f32 to vector<16x16xf32>
    %476 = arith.addf %475, %474 : vector<16x16xf32>
    %c2_267 = arith.constant 2 : index
    %c1_268 = arith.constant 1 : index
    %477 = memref.load %arg4[%c2_267, %c1_268] : memref<4x4xf32, #tpu.memory_space<smem>>
    %478 = vector.broadcast %477 : f32 to vector<16x16xf32>
    %479 = arith.mulf %478, %304 : vector<16x16xf32>
    %480 = arith.addf %466, %479 : vector<16x16xf32>
    %c2_269 = arith.constant 2 : index
    %c1_270 = arith.constant 1 : index
    %481 = memref.load %arg6[%c2_269, %c1_270] : memref<4x4xf32, #tpu.memory_space<smem>>
    %482 = vector.broadcast %481 : f32 to vector<16x16xf32>
    %483 = arith.mulf %482, %304 : vector<16x16xf32>
    %484 = arith.addf %471, %483 : vector<16x16xf32>
    %c2_271 = arith.constant 2 : index
    %c1_272 = arith.constant 1 : index
    %485 = memref.load %arg8[%c2_271, %c1_272] : memref<4x4xf32, #tpu.memory_space<smem>>
    %486 = vector.broadcast %485 : f32 to vector<16x16xf32>
    %487 = arith.mulf %486, %312 : vector<16x16xf32>
    %488 = arith.addf %476, %487 : vector<16x16xf32>
    %c2_273 = arith.constant 2 : index
    %c2_274 = arith.constant 2 : index
    %489 = memref.load %arg4[%c2_273, %c2_274] : memref<4x4xf32, #tpu.memory_space<smem>>
    %490 = vector.broadcast %489 : f32 to vector<16x16xf32>
    %491 = arith.mulf %490, %306 : vector<16x16xf32>
    %492 = arith.addf %480, %491 : vector<16x16xf32>
    %c2_275 = arith.constant 2 : index
    %c2_276 = arith.constant 2 : index
    %493 = memref.load %arg6[%c2_275, %c2_276] : memref<4x4xf32, #tpu.memory_space<smem>>
    %494 = vector.broadcast %493 : f32 to vector<16x16xf32>
    %495 = arith.mulf %494, %306 : vector<16x16xf32>
    %496 = arith.addf %484, %495 : vector<16x16xf32>
    %c2_277 = arith.constant 2 : index
    %c2_278 = arith.constant 2 : index
    %497 = memref.load %arg8[%c2_277, %c2_278] : memref<4x4xf32, #tpu.memory_space<smem>>
    %498 = vector.broadcast %497 : f32 to vector<16x16xf32>
    %499 = arith.mulf %498, %314 : vector<16x16xf32>
    %500 = arith.addf %488, %499 : vector<16x16xf32>
    %c2_279 = arith.constant 2 : index
    %c3_280 = arith.constant 3 : index
    %501 = memref.load %arg4[%c2_279, %c3_280] : memref<4x4xf32, #tpu.memory_space<smem>>
    %502 = vector.broadcast %501 : f32 to vector<16x16xf32>
    %503 = arith.mulf %502, %308 : vector<16x16xf32>
    %504 = arith.addf %492, %503 : vector<16x16xf32>
    %c2_281 = arith.constant 2 : index
    %c3_282 = arith.constant 3 : index
    %505 = memref.load %arg6[%c2_281, %c3_282] : memref<4x4xf32, #tpu.memory_space<smem>>
    %506 = vector.broadcast %505 : f32 to vector<16x16xf32>
    %507 = arith.mulf %506, %308 : vector<16x16xf32>
    %508 = arith.addf %496, %507 : vector<16x16xf32>
    %c2_283 = arith.constant 2 : index
    %c3_284 = arith.constant 3 : index
    %509 = memref.load %arg8[%c2_283, %c3_284] : memref<4x4xf32, #tpu.memory_space<smem>>
    %510 = vector.broadcast %509 : f32 to vector<16x16xf32>
    %511 = arith.mulf %510, %316 : vector<16x16xf32>
    %512 = arith.addf %500, %511 : vector<16x16xf32>
    %513 = arith.mulf %504, %508 : vector<16x16xf32>
    %cst_285 = arith.constant dense<0xFF800000> : vector<16xf32>
    %514 = vector.multi_reduction <maximumf>, %513, %cst_285 [1] : vector<16x16xf32> to vector<16xf32>
    %515 = vector.shape_cast %514 : vector<16xf32> to vector<16x1xf32>
    %516 = vector.broadcast %515 : vector<16x1xf32> to vector<16x16xf32>
    %517 = arith.subf %513, %516 : vector<16x16xf32>
    %518 = math.exp %517 : vector<16x16xf32>
    %cst_286 = arith.constant dense<0.000000e+00> : vector<16xf32>
    %519 = vector.multi_reduction <add>, %518, %cst_286 [1] : vector<16x16xf32> to vector<16xf32>
    %520 = vector.shape_cast %519 : vector<16xf32> to vector<16x1xf32>
    %521 = tpu.reciprocal %520 {approx = true} : vector<16x1xf32> -> vector<16x1xf32>
    %522 = vector.broadcast %0 : f32 to vector<16x1xf32>
    %523 = arith.mulf %522, %521 : vector<16x1xf32>
    %524 = vector.broadcast %523 : vector<16x1xf32> to vector<16x16xf32>
    %525 = arith.mulf %518, %524 : vector<16x16xf32>
    %526 = arith.addf %525, %512 : vector<16x16xf32>
    %c1_287 = arith.constant 1 : index
    %c2_288 = arith.constant 2 : index
    %c0_289 = arith.constant 0 : index
    %c0_290 = arith.constant 0 : index
    %527 = vector.load %arg11[%c1_287, %c2_288, %c0_289, %c0_290] : memref<2x4x16x16xf32, #tpu.memory_space<vmem>>, vector<1x1x16x16xf32>
    %528 = vector.shape_cast %527 : vector<1x1x16x16xf32> to vector<16x16xf32>
    %529 = vector.shape_cast %526 : vector<16x16xf32> to vector<1x1x16x16xf32>
    tpu.vector_store %arg11[%c1_287, %c2_288, %c0_289, %c0_290], %529 {strides = array<i32>} : memref<2x4x16x16xf32, #tpu.memory_space<vmem>>, vector<1x1x16x16xf32>,
    %c3_291 = arith.constant 3 : index
    %530 = memref.load %arg5[%c3_291] : memref<4xf32, #tpu.memory_space<smem>>
    %c3_292 = arith.constant 3 : index
    %531 = memref.load %arg7[%c3_292] : memref<4xf32, #tpu.memory_space<smem>>
    %c3_293 = arith.constant 3 : index
    %532 = memref.load %arg9[%c3_293] : memref<4xf32, #tpu.memory_space<smem>>
    %c3_294 = arith.constant 3 : index
    %c0_295 = arith.constant 0 : index
    %533 = memref.load %arg4[%c3_294, %c0_295] : memref<4x4xf32, #tpu.memory_space<smem>>
    %534 = vector.broadcast %533 : f32 to vector<16x16xf32>
    %535 = arith.mulf %534, %302 : vector<16x16xf32>
    %536 = vector.broadcast %530 : f32 to vector<16x16xf32>
    %537 = arith.addf %536, %535 : vector<16x16xf32>
    %c3_296 = arith.constant 3 : index
    %c0_297 = arith.constant 0 : index
    %538 = memref.load %arg6[%c3_296, %c0_297] : memref<4x4xf32, #tpu.memory_space<smem>>
    %539 = vector.broadcast %538 : f32 to vector<16x16xf32>
    %540 = arith.mulf %539, %302 : vector<16x16xf32>
    %541 = vector.broadcast %531 : f32 to vector<16x16xf32>
    %542 = arith.addf %541, %540 : vector<16x16xf32>
    %c3_298 = arith.constant 3 : index
    %c0_299 = arith.constant 0 : index
    %543 = memref.load %arg8[%c3_298, %c0_299] : memref<4x4xf32, #tpu.memory_space<smem>>
    %544 = vector.broadcast %543 : f32 to vector<16x16xf32>
    %545 = arith.mulf %544, %310 : vector<16x16xf32>
    %546 = vector.broadcast %532 : f32 to vector<16x16xf32>
    %547 = arith.addf %546, %545 : vector<16x16xf32>
    %c3_300 = arith.constant 3 : index
    %c1_301 = arith.constant 1 : index
    %548 = memref.load %arg4[%c3_300, %c1_301] : memref<4x4xf32, #tpu.memory_space<smem>>
    %549 = vector.broadcast %548 : f32 to vector<16x16xf32>
    %550 = arith.mulf %549, %304 : vector<16x16xf32>
    %551 = arith.addf %537, %550 : vector<16x16xf32>
    %c3_302 = arith.constant 3 : index
    %c1_303 = arith.constant 1 : index
    %552 = memref.load %arg6[%c3_302, %c1_303] : memref<4x4xf32, #tpu.memory_space<smem>>
    %553 = vector.broadcast %552 : f32 to vector<16x16xf32>
    %554 = arith.mulf %553, %304 : vector<16x16xf32>
    %555 = arith.addf %542, %554 : vector<16x16xf32>
    %c3_304 = arith.constant 3 : index
    %c1_305 = arith.constant 1 : index
    %556 = memref.load %arg8[%c3_304, %c1_305] : memref<4x4xf32, #tpu.memory_space<smem>>
    %557 = vector.broadcast %556 : f32 to vector<16x16xf32>
    %558 = arith.mulf %557, %312 : vector<16x16xf32>
    %559 = arith.addf %547, %558 : vector<16x16xf32>
    %c3_306 = arith.constant 3 : index
    %c2_307 = arith.constant 2 : index
    %560 = memref.load %arg4[%c3_306, %c2_307] : memref<4x4xf32, #tpu.memory_space<smem>>
    %561 = vector.broadcast %560 : f32 to vector<16x16xf32>
    %562 = arith.mulf %561, %306 : vector<16x16xf32>
    %563 = arith.addf %551, %562 : vector<16x16xf32>
    %c3_308 = arith.constant 3 : index
    %c2_309 = arith.constant 2 : index
    %564 = memref.load %arg6[%c3_308, %c2_309] : memref<4x4xf32, #tpu.memory_space<smem>>
    %565 = vector.broadcast %564 : f32 to vector<16x16xf32>
    %566 = arith.mulf %565, %306 : vector<16x16xf32>
    %567 = arith.addf %555, %566 : vector<16x16xf32>
    %c3_310 = arith.constant 3 : index
    %c2_311 = arith.constant 2 : index
    %568 = memref.load %arg8[%c3_310, %c2_311] : memref<4x4xf32, #tpu.memory_space<smem>>
    %569 = vector.broadcast %568 : f32 to vector<16x16xf32>
    %570 = arith.mulf %569, %314 : vector<16x16xf32>
    %571 = arith.addf %559, %570 : vector<16x16xf32>
    %c3_312 = arith.constant 3 : index
    %c3_313 = arith.constant 3 : index
    %572 = memref.load %arg4[%c3_312, %c3_313] : memref<4x4xf32, #tpu.memory_space<smem>>
    %573 = vector.broadcast %572 : f32 to vector<16x16xf32>
    %574 = arith.mulf %573, %308 : vector<16x16xf32>
    %575 = arith.addf %563, %574 : vector<16x16xf32>
    %c3_314 = arith.constant 3 : index
    %c3_315 = arith.constant 3 : index
    %576 = memref.load %arg6[%c3_314, %c3_315] : memref<4x4xf32, #tpu.memory_space<smem>>
    %577 = vector.broadcast %576 : f32 to vector<16x16xf32>
    %578 = arith.mulf %577, %308 : vector<16x16xf32>
    %579 = arith.addf %567, %578 : vector<16x16xf32>
    %c3_316 = arith.constant 3 : index
    %c3_317 = arith.constant 3 : index
    %580 = memref.load %arg8[%c3_316, %c3_317] : memref<4x4xf32, #tpu.memory_space<smem>>
    %581 = vector.broadcast %580 : f32 to vector<16x16xf32>
    %582 = arith.mulf %581, %316 : vector<16x16xf32>
    %583 = arith.addf %571, %582 : vector<16x16xf32>
    %584 = arith.mulf %575, %579 : vector<16x16xf32>
    %cst_318 = arith.constant dense<0xFF800000> : vector<16xf32>
    %585 = vector.multi_reduction <maximumf>, %584, %cst_318 [1] : vector<16x16xf32> to vector<16xf32>
    %586 = vector.shape_cast %585 : vector<16xf32> to vector<16x1xf32>
    %587 = vector.broadcast %586 : vector<16x1xf32> to vector<16x16xf32>
    %588 = arith.subf %584, %587 : vector<16x16xf32>
    %589 = math.exp %588 : vector<16x16xf32>
    %cst_319 = arith.constant dense<0.000000e+00> : vector<16xf32>
    %590 = vector.multi_reduction <add>, %589, %cst_319 [1] : vector<16x16xf32> to vector<16xf32>
    %591 = vector.shape_cast %590 : vector<16xf32> to vector<16x1xf32>
    %592 = tpu.reciprocal %591 {approx = true} : vector<16x1xf32> -> vector<16x1xf32>
    %593 = vector.broadcast %0 : f32 to vector<16x1xf32>
    %594 = arith.mulf %593, %592 : vector<16x1xf32>
    %595 = vector.broadcast %594 : vector<16x1xf32> to vector<16x16xf32>
    %596 = arith.mulf %589, %595 : vector<16x16xf32>
    %597 = arith.addf %596, %583 : vector<16x16xf32>
    %c1_320 = arith.constant 1 : index
    %c3_321 = arith.constant 3 : index
    %c0_322 = arith.constant 0 : index
    %c0_323 = arith.constant 0 : index
    %598 = vector.load %arg11[%c1_320, %c3_321, %c0_322, %c0_323] : memref<2x4x16x16xf32, #tpu.memory_space<vmem>>, vector<1x1x16x16xf32>
    %599 = vector.shape_cast %598 : vector<1x1x16x16xf32> to vector<16x16xf32>
    %600 = vector.shape_cast %597 : vector<16x16xf32> to vector<1x1x16x16xf32>
    tpu.vector_store %arg11[%c1_320, %c3_321, %c0_322, %c0_323], %600 {strides = array<i32>} : memref<2x4x16x16xf32, #tpu.memory_space<vmem>>, vector<1x1x16x16xf32>,
    return
  }
  func.func @transform_0(%arg0: i32, %arg1: i32) -> (i32, i32, i32, i32) {
    %c0_i32 = arith.constant 0 : i32
    %c0_i32_0 = arith.constant 0 : i32
    %c0_i32_1 = arith.constant 0 : i32
    return %arg0, %c0_i32, %arg1, %c0_i32_0 : i32, i32, i32, i32
  }
  func.func @transform_1(%arg0: i32, %arg1: i32) -> (i32, i32, i32, i32) {
    %c0_i32 = arith.constant 0 : i32
    %c0_i32_0 = arith.constant 0 : i32
    %c0_i32_1 = arith.constant 0 : i32
    return %arg0, %c0_i32, %arg1, %c0_i32_0 : i32, i32, i32, i32
  }
  func.func @transform_2(%arg0: i32, %arg1: i32) -> (i32, i32) {
    %c0_i32 = arith.constant 0 : i32
    %c0_i32_0 = arith.constant 0 : i32
    %c0_i32_1 = arith.constant 0 : i32
    return %c0_i32, %c0_i32_0 : i32, i32
  }
  func.func @transform_3(%arg0: i32, %arg1: i32) -> i32 {
    %c0_i32 = arith.constant 0 : i32
    %c0_i32_0 = arith.constant 0 : i32
    return %c0_i32 : i32
  }
  func.func @transform_4(%arg0: i32, %arg1: i32) -> (i32, i32) {
    %c0_i32 = arith.constant 0 : i32
    %c0_i32_0 = arith.constant 0 : i32
    %c0_i32_1 = arith.constant 0 : i32
    return %c0_i32, %c0_i32_0 : i32, i32
  }
  func.func @transform_5(%arg0: i32, %arg1: i32) -> i32 {
    %c0_i32 = arith.constant 0 : i32
    %c0_i32_0 = arith.constant 0 : i32
    return %c0_i32 : i32
  }
  func.func @transform_6(%arg0: i32, %arg1: i32) -> (i32, i32) {
    %c0_i32 = arith.constant 0 : i32
    %c0_i32_0 = arith.constant 0 : i32
    %c0_i32_1 = arith.constant 0 : i32
    return %c0_i32, %c0_i32_0 : i32, i32
  }
  func.func @transform_7(%arg0: i32, %arg1: i32) -> i32 {
    %c0_i32 = arith.constant 0 : i32
    %c0_i32_0 = arith.constant 0 : i32
    return %c0_i32 : i32
  }
  func.func @transform_8(%arg0: i32, %arg1: i32) -> i32 {
    %c0_i32 = arith.constant 0 : i32
    %c0_i32_0 = arith.constant 0 : i32
    return %c0_i32 : i32
  }
  func.func @transform_9(%arg0: i32, %arg1: i32) -> (i32, i32, i32, i32) {
    %c0_i32 = arith.constant 0 : i32
    %c0_i32_0 = arith.constant 0 : i32
    %c0_i32_1 = arith.constant 0 : i32
    return %arg0, %c0_i32, %arg1, %c0_i32_0 : i32, i32, i32, i32
  }
}

</mosaic_0001>

<bundles_post_ra>
// kernel: tpu_custom_call.1
= control target key start
LH: loop header
LB: loop body
LE: loop exit
PB: predicated region body
PF: predicated region fallthrough
CT: control target
= control target key end

     0   :  { %15 = vsyncpa [#allocation4], 0  ;;  %s2443_s0 = inlined_call_operand.hbm [shape: f32[2,4,16,16], index: 0, kind: input, shape index: {}]   ;;  %s2444_s1 = inlined_call_operand.hbm [shape: f32[2,4,16,16], index: 1, kind: input, shape index: {}]   ;;  %s2445_s2 = inlined_call_operand.vmem [shape: f32[4,4], index: 2, kind: input, shape index: {}]   ;;  %s2446_s3 = inlined_call_operand.vmem [shape: f32[4], index: 3, kind: input, shape index: {}]   ;;  %s2447_s4 = inlined_call_operand.vmem [shape: f32[4,4], index: 4, kind: input, shape index: {}]   ;;  %s2448_s5 = inlined_call_operand.vmem [shape: f32[4], index: 5, kind: input, shape index: {}]   ;;  %s2449_s6 = inlined_call_operand.vmem [shape: f32[4,4], index: 6, kind: input, shape index: {}]   ;;  %s2450_s7 = inlined_call_operand.vmem [shape: f32[4], index: 7, kind: input, shape index: {}]   ;;  %s2451_s8 = inlined_call_operand.<no memory space> [shape: f32[1], index: 8, kind: input, shape index: {}]   ;;  %s2452_s9 = inlined_call_operand.hbm [shape: f32[2,4,16,16], index: 9, kind: output, shape index: {}]  }
   0x1   :  { %16 = vsyncpa [#allocation8], 0 }
   0x2   :  { %17 = vsyncpa [#allocation6], 0 }
   0x3   :  { %18 = vsyncpa [#allocation11], 0 }
   0x4   :  { %19 = vsyncpa [#allocation14], 0 }
   0x5   :  { %20 = vsyncpa [#allocation17], 0  ;;  %s62_s11 = sshll.u32 %s2446_s3, 4  ;;  %s63_s11 = int_to_ptr.vmem [resolvable:$true] %s62_s11 }
   0x6   :  { %21 = vsyncpa [#allocation5], 0  ;;  %s82_s14 = sshll.u32 %s2448_s5, 4  ;;  %s1258_s15 = scalar_lea.vmem %s63_s11, 16  ;;  %s83_s14 = int_to_ptr.vmem [resolvable:$true] %s82_s14 }
   0x7   :  { %p1259_p0 = scmp.ne.s32.totalorder %s63_s11, %s1258_s15  ;;  %p1263_p1 = scmp.lt.s32.totalorder %s63_s11, %s63_s11 }
   0x8   :  { %p1264_p2 = scmp.lt.s32.totalorder %s1258_s15, %s1258_s15 }
   0xa   :  { %p1265_p3 = por %p1264_p2, %p1263_p1 }
   0xc   :  { %p1266_p4 = pnand %p1265_p3, %p1259_p0 }
   0xe   :  { %1269 = shalt.err (!%p1266_p4)
}
   0xf   :  { %s1410_s16 = smov [#allocation10]   ;;  %s1270_s17 = scalar_lea.vmem %s83_s14, 16 }
  0x10   :  { %65 = dma.vmem_to_smem %s63_s11, 16, %s1410_s16, [#allocation11]  }
  0x11   :  { %p1271_p5 = scmp.ne.s32.totalorder %s83_s14, %s1270_s17  ;;  %p1275_p6 = scmp.lt.s32.totalorder %s83_s14, %s83_s14 }
  0x12   :  { %p1276_p7 = scmp.lt.s32.totalorder %s1270_s17, %s1270_s17 }
  0x14   :  { %p1277_p8 = por %p1276_p7, %p1275_p6 }
  0x16   :  { %p1278_p9 = pnand %p1277_p8, %p1271_p5 }
  0x18   :  { %1281 = shalt.err (!%p1278_p9)
}
  0x19   :  { %s1411_s3 = smov [#allocation13]   ;;  %s1412_s5 = smov [#allocation3]  }
  0x1a   :  { %85 = dma.vmem_to_smem %s83_s14, 16, %s1411_s3, [#allocation14]  }
  0x1b   :  { %s27_s18 = sshll.u32 %s1412_s5, 4  ;;  %s1282_s21 = scalar_lea.hbm %s2443_s0, 2048  ;;  %s28_s18 = int_to_ptr.vmem [resolvable:$true] %s27_s18 }
  0x1c   :  { %p1283_p10 = scmp.ne.s32.totalorder %s2443_s0, %s1282_s21  ;;  %p1286_p11 = scmp.lt.u32.totalorder %s1282_s21, %s2443_s0 }
  0x1e   :  { %p1288_p12 = pnand %p1286_p11, %p1283_p10 }
  0x20   :  { %1291 = shalt.err (!%p1288_p12)
}
  0x21   :  { %s1292_s26 = scalar_lea.vmem %s28_s18, 2048  ;;  %p1297_p0 = scmp.lt.s32.totalorder %s28_s18, %s28_s18 }
  0x22   :  { %p1293_p13 = scmp.ne.s32.totalorder %s28_s18, %s1292_s26  ;;  %p1298_p1 = scmp.lt.s32.totalorder %s1292_s26, %s1292_s26 }
  0x24   :  { %p1299_p2 = por %p1298_p1, %p1297_p0 }
  0x26   :  { %p1300_p3 = pnand %p1299_p2, %p1293_p13 }
  0x28   :  { %1303 = shalt.err (!%p1300_p3)
}
  0x29   :  { %s1413_s27 = smov 128   ;;  %s1414_s28 = smov 8  }
  0x2a   :  { %33 = dma.hbm_to_vmem [thread:$0]  %s2443_s0, 2048, %s28_s18, [#allocation4], %s1413_s27, %s1413_s27, %s1414_s28  }
  0x2b   :  { %s1415_s10 = smov [#allocation7]   ;;  %s52_s14 = sshll.u32 %s2445_s2, 4  ;;  %s53_s14 = int_to_ptr.vmem [resolvable:$true] %s52_s14 }
  0x2c   :  { %s39_s11 = sshll.u32 %s1415_s10, 4  ;;  %s1304_s17 = scalar_lea.hbm %s2444_s1, 2048  ;;  %s40_s11 = int_to_ptr.vmem [resolvable:$true] %s39_s11 }
  0x2d   :  { %p1305_p4 = scmp.ne.s32.totalorder %s2444_s1, %s1304_s17  ;;  %p1308_p5 = scmp.lt.u32.totalorder %s1304_s17, %s2444_s1 }
  0x2f   :  { %p1310_p6 = pnand %p1308_p5, %p1305_p4 }
  0x31   :  { %1313 = shalt.err (!%p1310_p6)
}
  0x32   :  { %s1314_s0 = scalar_lea.vmem %s40_s11, 2048  ;;  %p1319_p8 = scmp.lt.s32.totalorder %s40_s11, %s40_s11 }
  0x33   :  { %p1315_p7 = scmp.ne.s32.totalorder %s40_s11, %s1314_s0  ;;  %p1320_p9 = scmp.lt.s32.totalorder %s1314_s0, %s1314_s0 }
  0x35   :  { %p1321_p10 = por %p1320_p9, %p1319_p8 }
  0x37   :  { %p1322_p11 = pnand %p1321_p10, %p1315_p7 }
  0x39   :  { %1325 = shalt.err (!%p1322_p11)
}
  0x3a   :  { %45 = dma.hbm_to_vmem [thread:$0]  %s2444_s1, 2048, %s40_s11, [#allocation8], %s1413_s27, %s1413_s27, %s1414_s28  }
  0x3b   :  { %s72_s23 = sshll.u32 %s2447_s4, 4  ;;  %s1326_s24 = scalar_lea.vmem %s53_s14, 64  ;;  %s73_s23 = int_to_ptr.vmem [resolvable:$true] %s72_s23 }
  0x3c   :  { %p1327_p12 = scmp.ne.s32.totalorder %s53_s14, %s1326_s24  ;;  %p1331_p13 = scmp.lt.s32.totalorder %s53_s14, %s53_s14 }
  0x3d   :  { %p1332_p0 = scmp.lt.s32.totalorder %s1326_s24, %s1326_s24 }
  0x3f   :  { %p1333_p1 = por %p1332_p0, %p1331_p13 }
  0x41   :  { %p1334_p2 = pnand %p1333_p1, %p1327_p12 }
  0x43   :  { %1337 = shalt.err (!%p1334_p2)
}
  0x44   :  { %s1416_s25 = smov [#allocation9]   ;;  %s1338_s26 = scalar_lea.vmem %s73_s23, 64 }
  0x45   :  { %55 = dma.vmem_to_smem %s53_s14, 64, %s1416_s25, [#allocation6]  }
  0x46   :  { %p1339_p3 = scmp.ne.s32.totalorder %s73_s23, %s1338_s26  ;;  %p1343_p4 = scmp.lt.s32.totalorder %s73_s23, %s73_s23 }
  0x47   :  { %p1344_p5 = scmp.lt.s32.totalorder %s1338_s26, %s1338_s26 }
  0x49   :  { %p1345_p6 = por %p1344_p5, %p1343_p4 }
  0x4b   :  { %p1346_p7 = pnand %p1345_p6, %p1339_p3 }
  0x4d   :  { %1349 = shalt.err (!%p1346_p7)
}
  0x4e   :  { %s1417_s1 = smov [#allocation12]   ;;  %s92_s30 = sshll.u32 %s2449_s6, 4  ;;  %s93_s30 = int_to_ptr.vmem [resolvable:$true] %s92_s30 }
  0x4f   :  { %75 = dma.vmem_to_smem %s73_s23, 64, %s1417_s1, [#allocation11]  }
  0x50   :  { %s102_s12 = sshll.u32 %s2450_s7, 4  ;;  %s1350_s13 = scalar_lea.vmem %s93_s30, 64  ;;  %s103_s12 = int_to_ptr.vmem [resolvable:$true] %s102_s12 }
  0x51   :  { %p1351_p8 = scmp.ne.s32.totalorder %s93_s30, %s1350_s13  ;;  %p1355_p9 = scmp.lt.s32.totalorder %s93_s30, %s93_s30 }
  0x52   :  { %p1356_p10 = scmp.lt.s32.totalorder %s1350_s13, %s1350_s13 }
  0x54   :  { %p1357_p11 = por %p1356_p10, %p1355_p9 }
  0x56   :  { %p1358_p12 = pnand %p1357_p11, %p1351_p8 }
  0x58   :  { %1361 = shalt.err (!%p1358_p12)
}
  0x59   :  { %s1418_s14 = smov [#allocation15]   ;;  %s1362_s15 = scalar_lea.vmem %s103_s12, 16 }
  0x5a   :  { %95 = dma.vmem_to_smem %s93_s30, 64, %s1418_s14, [#allocation14]  }
  0x5b   :  { %p1363_p13 = scmp.ne.s32.totalorder %s103_s12, %s1362_s15  ;;  %p1367_p0 = scmp.lt.s32.totalorder %s103_s12, %s103_s12 }
  0x5c   :  { %p1368_p1 = scmp.lt.s32.totalorder %s1362_s15, %s1362_s15 }
  0x5e   :  { %p1369_p2 = por %p1368_p1, %p1367_p0 }
  0x60   :  { %p1370_p3 = pnand %p1369_p2, %p1363_p13 }
  0x62   :  { %1373 = shalt.err (!%p1370_p3)
}
  0x63   :  { %s1419_s6 = smov [#allocation16]  }
  0x64   :  { %105 = dma.vmem_to_smem %s103_s12, 16, %s1419_s6, [#allocation17]  }
  0x65   :  { %1396 = dma.done.wait [#allocation4], 2048  }
  0x66   :  { %1397 = vsyncadd [#allocation4], 4294965248 }
  0x67   :  { %1398 = dma.done.wait [#allocation8], 2048  }
  0x68   :  { %1399 = vsyncadd [#allocation8], 4294965248 }
  0x69   :  { %1400 = dma.done.wait [#allocation6], 64  }
  0x6a   :  { %1401 = vsyncadd [#allocation6], 4294967232 }
  0x6b   :  { %1402 = dma.done.wait [#allocation11], 80  }
  0x6c   :  { %1403 = vsyncadd [#allocation11], 4294967216 }
  0x6d   :  { %1404 = dma.done.wait [#allocation14], 80  }
  0x6e   :  { %1405 = vsyncadd [#allocation14], 4294967216 }
  0x6f   :  { %1406 = dma.done.wait [#allocation17], 16  }
  0x70   :  { %1407 = vsyncadd [#allocation17], 4294967280 }
  0x71   :  { %132 = sfence }
  0x72   :  { %s156_s7 = sld [smem:[#allocation10]]  ;;  %s1075_s5 = sld [smem:[#allocation9 + $0x1]]  ;;  %v1521_v0 = vld [vmem:[#allocation7] sm:$0xff]  ;;  %v1527_v1 = vld [vmem:[#allocation7 + $0x8] sm:$0xff]  ;;  %v1529_v2 = vld [vmem:[#allocation7 + $0x10] sm:$0xff]  ;;  %vm236_vm0 = vcmask 130048  }
  0x73   :  { %s157_s16 = sld [smem:[#allocation13]]  ;;  %s1076_s19 = sld [smem:[#allocation12 + $0x1]]  ;;  %v1535_v3 = vld [vmem:[#allocation7 + $0x20] sm:$0xff]  ;;  %v1559_v11 = vld [vmem:[#allocation7 + $0x30] sm:$0xff]  ;;  %v1631_v48 = vld [vmem:[#allocation7 + $0x18] sm:$0xff] }
  0x74   :  { %s159_s17 = sld [smem:[#allocation9]]  ;;  %s1078_s20 = sld [smem:[#allocation9 + $0x2]]  ;;  %v1641_v53 = vld [vmem:[#allocation7 + $0x28] sm:$0xff]  ;;  %v1651_v59 = vld [vmem:[#allocation7 + $0x38] sm:$0xff] }
  0x75   :  { %s166_s3 = sld [smem:[#allocation12]]  ;;  %s1079_s0 = sld [smem:[#allocation12 + $0x2]] }
  0x76   :  { %s1519_s2 = sld [smem:[#allocation9 + $0x3]]  ;;  %s1525_s21 = sld [smem:[#allocation10 + $0x1]] }
  0x77   :  { %s1523_s18 = sld [smem:[#allocation12 + $0x3]]  ;;  %s1531_s22 = sld [smem:[#allocation13 + $0x1]] }
  0x78   :  { %s1533_s23 = sld [smem:[#allocation9 + $0x80]]  ;;  %v1539_v5 = vstv %s156_s7  ;;  %s1545_s25 = sld [smem:[#allocation9 + $0x81]]  ;;  %v1551_v9 = vstv %s1075_s5 }
  0x79   :  { %v1541_v6 = vstv %s157_s16  ;;  %s1543_s24 = sld [smem:[#allocation12 + $0x80]]  ;;  %s1553_s26 = sld [smem:[#allocation12 + $0x81]]  ;;  %v182_v13 = vmul.f32 %v1551_v9, %v1529_v2  ;;  %v1565_v14 = vstv %s1076_s19  ;;  %v183_v62 = vmul.f32 %v1551_v9, %v1631_v48 }
  0x7a   :  { %v1537_v4 = vstv %s159_s17  ;;  %s1555_s1 = sld [smem:[#allocation9 + $0x82]]  ;;  %v1567_v15 = vstv %s1078_s20  ;;  %v188_v17 = vmul.f32 %v1565_v14, %v1529_v2  ;;  %s1578_s29 = sld [smem:[#allocation9 + $0x83]] }
  0x7b   :  { %v161_v7 = vmul.f32 %v1537_v4, %v1521_v0  ;;  %v1549_v8 = vstv %s166_s3  ;;  %v162_v10 = vmul.f32 %v1537_v4, %v1527_v1  ;;  %s1569_s4 = sld [smem:[#allocation12 + $0x82]]  ;;  %v200_v18 = vmul.f32 %v1567_v15, %v1535_v3  ;;  %s1580_s30 = sld [smem:[#allocation12 + $0x83]] }
  0x7c   :  { %v168_v12 = vmul.f32 %v1549_v8, %v1521_v0  ;;  %v1576_v19 = vstv %s1079_s0  ;;  %v1586_v22 = vstv %s1519_s2  ;;  %v1601_v30 = vstv %s1525_s21  ;;  %s1649_s10 = sld [smem:[#allocation10 + $0x2]]  ;;  %s1658_s11 = sld [smem:[#allocation9 + $0x100]] }
  0x7d   :  { %v164_v16 = vadd.f32 %v1539_v5, %v161_v7  ;;  %v206_v21 = vmul.f32 %v1576_v19, %v1535_v3  ;;  %v1589_v23 = vstv %s1523_s18  ;;  %v218_v25 = vmul.f32 %v1586_v22, %v1559_v11  ;;  %s1660_s12 = sld [smem:[#allocation12 + $0x100]]  ;;  %s1668_s13 = sld [smem:[#allocation13 + $0x2]] }
  0x7e   :  { %v171_v20 = vadd.f32 %v1541_v6, %v168_v12  ;;  %v224_v26 = vmul.f32 %v1589_v23, %v1559_v11  ;;  %v1596_v27 = vstv %s1533_s23  ;;  %v1609_v34 = vstv %s1531_s22  ;;  %s1673_s14 = sld [smem:[#allocation9 + $0x101]]  ;;  %s1689_s6 = sld [smem:[#allocation9 + $0x102]] }
  0x7f   :  { %v184_v24 = vadd.f32 %v182_v13, %v164_v16  ;;  %v271_v29 = vmul.f32 %v1596_v27, %v1521_v0  ;;  %v1604_v31 = vstv %s1543_s24  ;;  %v1612_v35 = vstv %s1545_s25  ;;  %s1675_s15 = sld [smem:[#allocation12 + $0x101]]  ;;  %s1697_s7 = sld [smem:[#allocation12 + $0x102]] }
  0x80   :  { %v190_v28 = vadd.f32 %v188_v17, %v171_v20  ;;  %v278_v33 = vmul.f32 %v1604_v31, %v1521_v0  ;;  %v292_v38 = vmul.f32 %v1612_v35, %v1529_v2  ;;  %v1618_v39 = vstv %s1553_s26  ;;  %s1699_s16 = sld [smem:[#allocation9 + $0x103]]  ;;  %s1737_s3 = sld [smem:[#allocation9 + $0x180]] }
  0x81   :  { %v202_v32 = vadd.f32 %v200_v18, %v184_v24  ;;  %v274_v37 = vadd.f32 %v1601_v30, %v271_v29  ;;  %v298_v42 = vmul.f32 %v1618_v39, %v1529_v2  ;;  %v1624_v43 = vstv %s1555_s1  ;;  %s1709_s17 = sld [smem:[#allocation12 + $0x103]]  ;;  %s1750_s19 = sld [smem:[#allocation12 + $0x180]] }
  0x82   :  { %v208_v36 = vadd.f32 %v206_v21, %v190_v28  ;;  %v281_v41 = vadd.f32 %v1609_v34, %v278_v33  ;;  %v310_v46 = vmul.f32 %v1624_v43, %v1535_v3  ;;  %v1629_v47 = vstv %s1569_s4  ;;  %s1748_s5 = sld [smem:[#allocation10 + $0x3]]  ;;  %s1768_s0 = sld [smem:[#allocation9 + $0x181]] }
  0x83   :  { %v220_v40 = vadd.f32 %v218_v25, %v202_v32  ;;  %v294_v45 = vadd.f32 %v292_v38, %v274_v37  ;;  %v316_v50 = vmul.f32 %v1629_v47, %v1535_v3  ;;  %v1636_v51 = vstv %s1578_s29  ;;  %s1762_s20 = sld [smem:[#allocation13 + $0x3]]  ;;  %s1770_s2 = sld [smem:[#allocation12 + $0x181]] }
  0x84   :  { %v226_v44 = vadd.f32 %v224_v26, %v208_v36  ;;  %v300_v49 = vadd.f32 %v298_v42, %v281_v41  ;;  %v1639_v52 = vstv %s1580_s30  ;;  %v328_v56 = vmul.f32 %v1636_v51, %v1559_v11  ;;  %s1781_s18 = sld [smem:[#allocation9 + $0x182]]  ;;  %s1789_s22 = sld [smem:[#allocation9 + $0x183]] }
  0x85   :  { %v312_v55 = vadd.f32 %v310_v46, %v294_v45  ;;  %v334_v57 = vmul.f32 %v1639_v52, %v1559_v11  ;;  %v165_v60 = vadd.f32 %v1539_v5, %v162_v10  ;;  %v169_v61 = vmul.f32 %v1549_v8, %v1527_v1  ;;  %s1787_s21 = sld [smem:[#allocation12 + $0x182]]  ;;  %s1801_s23 = sld [smem:[#allocation12 + $0x183]] }
  0x86   :  { %v1643_v54 = vmul.f32 %v226_v44, %v220_v40  ;;  %v318_v58 = vadd.f32 %v316_v50, %v300_v49  ;;  %v189_v12 = vmul.f32 %v1565_v14, %v1631_v48  ;;  %v201_v10 = vmul.f32 %v1567_v15, %v1641_v53  ;;  %s173_s24 = sld [smem:[#allocation15]]  ;;  %s1077_s26 = sld [smem:[#allocation15 + $0x1]] }
  0x87   :  { %v330_v7 = vadd.f32 %v328_v56, %v312_v55  ;;  %v172_v16 = vadd.f32 %v1541_v6, %v169_v61  ;;  %v185_v17 = vadd.f32 %v183_v62, %v165_v60  ;;  %v207_v18 = vmul.f32 %v1576_v19, %v1641_v53  ;;  %s158_s25 = sld [smem:[#allocation16]]  ;;  %s1080_s4 = sld [smem:[#allocation15 + $0x2]] }
  0x88   :  { %2467 = vst [vmem:[#allocation26_spill] sm:$0xff] %v1643_v54  ;;  %v237_v63 = vsel %vm236_vm0, %v1643_v54, -inf  ;;  %v336_v13 = vadd.f32 %v334_v57, %v318_v58  ;;  %v219_v20 = vmul.f32 %v1586_v22, %v1651_v59  ;;  %v225_v21 = vmul.f32 %v1589_v23, %v1651_v59  ;;  %s1089_s1 = sld [smem:[#allocation15 + $0x80]]  ;;  %s1086_s29 = sld [smem:[#allocation16 + $0x1]] }
  0x89   :  { %238 = vmax.xlane.f32.xlu0 %v237_v63  ;;  %v272_v24 = vmul.f32 %v1596_v27, %v1527_v1  ;;  %v279_v25 = vmul.f32 %v1604_v31, %v1527_v1  ;;  %v191_v28 = vadd.f32 %v189_v12, %v172_v16  ;;  %v203_v29 = vadd.f32 %v201_v10, %v185_v17  ;;  %s1092_s30 = sld [smem:[#allocation15 + $0x81]] }
  0x8a   :  { %v1685_v26 = vmul.f32 %v336_v13, %v330_v7  ;;  %v293_v32 = vmul.f32 %v1612_v35, %v1631_v48  ;;  %v299_v37 = vmul.f32 %v1618_v39, %v1631_v48  ;;  %v311_v38 = vmul.f32 %v1624_v43, %v1641_v53 }
  0x8b   :  { %v275_v33 = vadd.f32 %v1601_v30, %v272_v24  ;;  %v282_v36 = vadd.f32 %v1609_v34, %v279_v25  ;;  %v209_v41 = vadd.f32 %v207_v18, %v191_v28  ;;  %v221_v42 = vadd.f32 %v219_v20, %v203_v29 }
  0x8c   :  { %2468 = vst [vmem:[#allocation27_spill] sm:$0xff] %v1685_v26  ;;  %v346_v40 = vsel %vm236_vm0, %v1685_v26, -inf  ;;  %v317_v44 = vmul.f32 %v1629_v47, %v1641_v53  ;;  %v329_v49 = vmul.f32 %v1636_v51, %v1651_v59  ;;  %v335_v50 = vmul.f32 %v1639_v52, %v1651_v59 }
  0x8d   :  { %347 = vmax.xlane.f32.xlu1 %v346_v40  ;;  %v295_v45 = vadd.f32 %v293_v32, %v275_v33  ;;  %v301_v46 = vadd.f32 %v299_v37, %v282_v36  ;;  %v227_v55 = vadd.f32 %v225_v21, %v209_v41  ;;  %v1712_v56 = vstv %s1658_s11  ;;  %s1095_s11 = sld [smem:[#allocation15 + $0x82]] }
  0x8e   :  { %v1715_v57 = vstv %s1649_s10  ;;  %v1718_v58 = vstv %s1660_s12  ;;  %v380_v62 = vmul.f32 %v1712_v56, %v1521_v0  ;;  %v1727_v12 = vstv %s1668_s13  ;;  %s1083_s10 = sld [smem:[#allocation15 + $0x3]]  ;;  %s1104_s13 = sld [smem:[#allocation15 + $0x100]] }
  0x8f   :  { %v313_v60 = vadd.f32 %v311_v38, %v295_v45  ;;  %v319_v61 = vadd.f32 %v317_v44, %v301_v46  ;;  %v387_v63 = vmul.f32 %v1718_v58, %v1521_v0  ;;  %v1724_v7 = vmul.f32 %v227_v55, %v221_v42  ;;  %s1098_s12 = sld [smem:[#allocation15 + $0x83]] }
  0x90   :  { %v1730_v10 = vstv %s1673_s14  ;;  %v1733_v13 = vstv %s1675_s15  ;;  %v383_v18 = vadd.f32 %v1715_v57, %v380_v62  ;;  %v1746_v28 = vstv %s1689_s6  ;;  %s1101_s6 = sld [smem:[#allocation16 + $0x2]] }
  0x91   :  { %2469 = vst [vmem:[#allocation28_spill] sm:$0xff] %v1724_v7  ;;  %v331_v16 = vadd.f32 %v329_v49, %v313_v60  ;;  %v337_v17 = vadd.f32 %v335_v50, %v319_v61  ;;  %v390_v20 = vadd.f32 %v1727_v12, %v387_v63  ;;  %v240_v21 = vsel %vm236_vm0, %v1724_v7, -inf }
  0x92   :  { %v401_v24 = vmul.f32 %v1730_v10, %v1529_v2  ;;  %v407_v25 = vmul.f32 %v1733_v13, %v1529_v2  ;;  %241 = vmax.xlane.f32.xlu0 %v240_v21  ;;  %v419_v32 = vmul.f32 %v1746_v28, %v1535_v3  ;;  %v1757_v33 = vstv %s1697_s7  ;;  %s1107_s7 = sld [smem:[#allocation15 + $0x101]] }
  0x93   :  { %v1752_v29 = vmul.f32 %v337_v17, %v331_v16  ;;  %v1760_v36 = vstv %s1699_s16  ;;  %v425_v40 = vmul.f32 %v1757_v33, %v1535_v3  ;;  %v1775_v44 = vstv %s1709_s17  ;;  %s1113_s16 = sld [smem:[#allocation15 + $0x103]]  ;;  %s1119_s17 = sld [smem:[#allocation15 + $0x180]] }
  0x94   :  { %v403_v37 = vadd.f32 %v401_v24, %v383_v18  ;;  %v409_v38 = vadd.f32 %v407_v25, %v390_v20  ;;  %v437_v41 = vmul.f32 %v1760_v36, %v1559_v11  ;;  %v381_v45 = vmul.f32 %v1712_v56, %v1527_v1 }
  0x95   :  { %2470 = vst [vmem:[#allocation29_spill] sm:$0xff] %v1752_v29  ;;  %v349_v42 = vsel %vm236_vm0, %v1752_v29, -inf  ;;  %v388_v46 = vmul.f32 %v1718_v58, %v1527_v1  ;;  %v443_v55 = vmul.f32 %v1775_v44, %v1559_v11  ;;  %v402_v60 = vmul.f32 %v1730_v10, %v1631_v48  ;;  %v1870_v29 = vld [vmem:[#allocation7 + $0x40] sm:$0xff] }
  0x96   :  { %350 = vmax.xlane.f32.xlu1 %v349_v42  ;;  %v421_v49 = vadd.f32 %v419_v32, %v403_v37  ;;  %v427_v50 = vadd.f32 %v425_v40, %v409_v38  ;;  %v384_v61 = vadd.f32 %v1715_v57, %v381_v45  ;;  %v408_v63 = vmul.f32 %v1733_v13, %v1631_v48 }
  0x97   :  { %v391_v62 = vadd.f32 %v1727_v12, %v388_v46  ;;  %v420_v16 = vmul.f32 %v1746_v28, %v1641_v53  ;;  %v426_v20 = vmul.f32 %v1757_v33, %v1641_v53  ;;  %v438_v21 = vmul.f32 %v1760_v36, %v1651_v59 }
  0x98   :  { %v439_v17 = vadd.f32 %v437_v41, %v421_v49  ;;  %v445_v18 = vadd.f32 %v443_v55, %v427_v50  ;;  %v404_v24 = vadd.f32 %v402_v60, %v384_v61  ;;  %v444_v32 = vmul.f32 %v1775_v44, %v1651_v59 }
  0x99   :  { %v410_v25 = vadd.f32 %v408_v63, %v391_v62  ;;  %v1806_v37 = vstv %s1737_s3  ;;  %v1813_v41 = vstv %s1748_s5  ;;  %v1816_v42 = vstv %s1750_s19  ;;  %s1116_s3 = sld [smem:[#allocation16 + $0x3]]  ;;  %s1122_s5 = sld [smem:[#allocation15 + $0x181]] }
  0x9a   :  { %v1808_v38 = vmul.f32 %v445_v18, %v439_v17  ;;  %v489_v40 = vmul.f32 %v1806_v37, %v1521_v0  ;;  %v422_v45 = vadd.f32 %v420_v16, %v404_v24  ;;  %v496_v49 = vmul.f32 %v1816_v42, %v1521_v0  ;;  %s1125_s19 = sld [smem:[#allocation15 + $0x182]] }
  0x9b   :  { %v428_v46 = vadd.f32 %v426_v20, %v410_v25  ;;  %v1821_v50 = vstv %s1762_s20  ;;  %v1827_v61 = vstv %s1768_s0  ;;  %v1830_v62 = vstv %s1770_s2  ;;  %s1128_s20 = sld [smem:[#allocation15 + $0x183]]  ;;  %s1420_s0 = smov [#allocation18]  }
  0x9c   :  { %2471 = vst [vmem:[#allocation30_spill] sm:$0xff] %v1808_v38  ;;  %2472 = vst [vmem:[#allocation31_spill] sm:$0xff] %v1821_v50  ;;  %v455_v55 = vsel %vm236_vm0, %v1808_v38, -inf  ;;  %v492_v60 = vadd.f32 %v1813_v41, %v489_v40  ;;  %v440_v63 = vadd.f32 %v438_v21, %v422_v45  ;;  %v499_v17 = vadd.f32 %v1821_v50, %v496_v49  ;;  %s1058_s2 = sshll.u32 %s1420_s0, 4  ;;  %s1059_s2 = int_to_ptr.vmem [resolvable:$true] %s1058_s2 }
  0x9d   :  { %456 = vmax.xlane.f32.xlu0 %v455_v55  ;;  %v446_v16 = vadd.f32 %v444_v32, %v428_v46  ;;  %v510_v0 = vmul.f32 %v1827_v61, %v1529_v2  ;;  %v516_v18 = vmul.f32 %v1830_v62, %v1529_v2  ;;  %v1838_v20 = vstv %s1781_s18  ;;  %s1374_s18 = scalar_lea.vmem %s1059_s2, 2048  ;;  %p1379_p5 = scmp.lt.s32.totalorder %s1059_s2, %s1059_s2 }
  0x9e   :  { %v1841_v24 = vstv %s1787_s21  ;;  %v1844_v25 = vstv %s1789_s22  ;;  %v528_v21 = vmul.f32 %v1838_v20, %v1535_v3  ;;  %v1855_v2 = vstv %s1801_s23  ;;  %p1375_p4 = scmp.ne.s32.totalorder %s1059_s2, %s1374_s18  ;;  %p1380_p6 = scmp.lt.s32.totalorder %s1374_s18, %s1374_s18 }
  0x9f   :  { %2473 = vst [vmem:[#allocation32_spill] sm:$0xff] %v1841_v24  ;;  %2474 = vst [vmem:[#allocation33_spill] sm:$0xff] %v1844_v25  ;;  %v1846_v40 = vmul.f32 %v446_v16, %v440_v63  ;;  %v512_v38 = vadd.f32 %v510_v0, %v492_v60  ;;  %v534_v32 = vmul.f32 %v1841_v24, %v1535_v3 }
  0xa0   :  { %v518_v45 = vadd.f32 %v516_v18, %v499_v17  ;;  %v546_v46 = vmul.f32 %v1844_v25, %v1559_v11  ;;  %2476 = vst [vmem:[#allocation35_spill] sm:$0xff] %v1855_v2  ;;  %v490_v49 = vmul.f32 %v1806_v37, %v1527_v1  ;;  %v552_v60 = vmul.f32 %v1855_v2, %v1559_v11  ;;  %p1381_p7 = por %p1380_p6, %p1379_p5 }
  0xa1   :  { %2475 = vst [vmem:[#allocation34_spill] sm:$0xff] %v1846_v40  ;;  %v458_v55 = vsel %vm236_vm0, %v1846_v40, -inf  ;;  %v530_v63 = vadd.f32 %v528_v21, %v512_v38  ;;  %v497_v16 = vmul.f32 %v1816_v42, %v1527_v1  ;;  %v511_v0 = vmul.f32 %v1827_v61, %v1631_v48  ;;  %v1872_v40 = vld [vmem:[#allocation7 + $0x50] sm:$0xff] }
  0xa2   :  { %459 = vmax.xlane.f32.xlu1 %v458_v55  ;;  %v536_v3 = vadd.f32 %v534_v32, %v518_v45  ;;  %v493_v17 = vadd.f32 %v1813_v41, %v490_v49  ;;  %v517_v18 = vmul.f32 %v1830_v62, %v1631_v48  ;;  %v529_v1 = vmul.f32 %v1838_v20, %v1641_v53  ;;  %v1879_v32 = vld [vmem:[#allocation7 + $0x60] sm:$0xff]  ;;  %p1382_p8 = pnand %p1381_p7, %p1375_p4 }
  0xa3   :  { %v548_v38 = vadd.f32 %v546_v46, %v530_v63  ;;  %v500_v11 = vadd.f32 %v1821_v50, %v497_v16  ;;  %v535_v21 = vmul.f32 %v1841_v24, %v1641_v53  ;;  %v547_v48 = vmul.f32 %v1844_v25, %v1651_v59  ;;  %v1885_v46 = vld [vmem:[#allocation7 + $0x70] sm:$0xff]  ;;  %v1915_v25 = vld [vmem:[#allocation7 + $0x78] sm:$0xff] }
  0xa4   :  { %v554_v45 = vadd.f32 %v552_v60, %v536_v3  ;;  %v513_v49 = vadd.f32 %v511_v0, %v493_v17  ;;  %v553_v55 = vmul.f32 %v1855_v2, %v1651_v59  ;;  %v622_v63 = vmul.f32 %v1870_v29, %v1537_v4  ;;  %v1899_v0 = vld [vmem:[#allocation7 + $0x48] sm:$0xff]  ;;  %v1905_v2 = vld [vmem:[#allocation7 + $0x58] sm:$0xff] }
  0xa5   :  { %v519_v7 = vadd.f32 %v517_v18, %v500_v11  ;;  %v629_v16 = vmul.f32 %v1870_v29, %v1549_v8  ;;  %v643_v53 = vmul.f32 %v1872_v40, %v1551_v9  ;;  %v649_v17 = vmul.f32 %v1872_v40, %v1565_v14 }
  0xa6   :  { %v1893_v60 = vmul.f32 %v554_v45, %v548_v38  ;;  %v531_v3 = vadd.f32 %v529_v1, %v513_v49  ;;  %v661_v59 = vmul.f32 %v1879_v32, %v1567_v15  ;;  %v625_v11 = vadd.f32 %v622_v63, %v1539_v5  ;;  %v1907_v38 = vld [vmem:[#allocation7 + $0x68] sm:$0xff] }
  0xa7   :  { %v537_v18 = vadd.f32 %v535_v21, %v519_v7  ;;  %v632_v26 = vadd.f32 %v629_v16, %v1541_v6  ;;  %v667_v54 = vmul.f32 %v1879_v32, %v1576_v19  ;;  %v679_v49 = vmul.f32 %v1885_v46, %v1586_v22 }
  0xa8   :  { %v564_v1 = vsel %vm236_vm0, %v1893_v60, -inf  ;;  %v549_v45 = vadd.f32 %v547_v48, %v531_v3  ;;  %v685_v7 = vmul.f32 %v1885_v46, %v1589_v23  ;;  %v645_v63 = vadd.f32 %v643_v53, %v625_v11 }
  0xa9   :  { %565 = vmax.xlane.f32.xlu0 %v564_v1  ;;  %v555_v21 = vadd.f32 %v553_v55, %v537_v18  ;;  %v651_v16 = vadd.f32 %v649_v17, %v632_v26  ;;  %v623_v24 = vmul.f32 %v1899_v0, %v1537_v4  ;;  %v630_v50 = vmul.f32 %v1899_v0, %v1549_v8 }
  0xaa   :  { %v644_v48 = vmul.f32 %v1905_v2, %v1551_v9  ;;  %v650_v3 = vmul.f32 %v1905_v2, %v1565_v14  ;;  %v662_v1 = vmul.f32 %v1907_v38, %v1567_v15  ;;  %v663_v26 = vadd.f32 %v661_v59, %v645_v63 }
  0xab   :  { %v1927_v55 = vmul.f32 %v555_v21, %v549_v45  ;;  %v669_v53 = vadd.f32 %v667_v54, %v651_v16  ;;  %v626_v17 = vadd.f32 %v623_v24, %v1539_v5  ;;  %v633_v4 = vadd.f32 %v630_v50, %v1541_v6 }
  0xac   :  { %v668_v8 = vmul.f32 %v1907_v38, %v1576_v19  ;;  %v680_v9 = vmul.f32 %v1915_v25, %v1586_v22  ;;  %v686_v14 = vmul.f32 %v1915_v25, %v1589_v23  ;;  %v681_v18 = vadd.f32 %v679_v49, %v663_v26 }
  0xad   :  { %v567_v15 = vsel %vm236_vm0, %v1927_v55, -inf  ;;  %v687_v11 = vadd.f32 %v685_v7, %v669_v53  ;;  %v646_v59 = vadd.f32 %v644_v48, %v626_v17  ;;  %v652_v54 = vadd.f32 %v650_v3, %v633_v4 }
  0xae   :  { %568 = vmax.xlane.f32.xlu1 %v567_v15  ;;  %v731_v5 = vmul.f32 %v1870_v29, %v1596_v27  ;;  %v738_v6 = vmul.f32 %v1870_v29, %v1604_v31  ;;  %v752_v19 = vmul.f32 %v1872_v40, %v1612_v35  ;;  %v758_v50 = vmul.f32 %v1872_v40, %v1618_v39 }
  0xaf   :  { %v1945_v22 = vmul.f32 %v687_v11, %v681_v18  ;;  %v664_v23 = vadd.f32 %v662_v1, %v646_v59  ;;  %v770_v24 = vmul.f32 %v1879_v32, %v1624_v43  ;;  %v670_v45 = vadd.f32 %v668_v8, %v652_v54 }
  0xb0   :  { %v734_v49 = vadd.f32 %v731_v5, %v1601_v30  ;;  %v741_v7 = vadd.f32 %v738_v6, %v1609_v34  ;;  %v776_v21 = vmul.f32 %v1879_v32, %v1629_v47  ;;  %v788_v48 = vmul.f32 %v1885_v46, %v1636_v51 }
  0xb1   :  { %v697_v63 = vsel %vm236_vm0, %v1945_v22, -inf  ;;  %v682_v16 = vadd.f32 %v680_v9, %v664_v23  ;;  %v794_v3 = vmul.f32 %v1885_v46, %v1639_v52  ;;  %v688_v1 = vadd.f32 %v686_v14, %v670_v45 }
  0xb2   :  { %698 = vmax.xlane.f32.xlu0 %v697_v63  ;;  %v754_v26 = vadd.f32 %v752_v19, %v734_v49  ;;  %v760_v53 = vadd.f32 %v758_v50, %v741_v7  ;;  %v732_v17 = vmul.f32 %v1899_v0, %v1596_v27  ;;  %v739_v4 = vmul.f32 %v1899_v0, %v1604_v31 }
  0xb3   :  { %v753_v8 = vmul.f32 %v1905_v2, %v1612_v35  ;;  %v759_v9 = vmul.f32 %v1905_v2, %v1618_v39  ;;  %v771_v15 = vmul.f32 %v1907_v38, %v1624_v43  ;;  %v1971_v18 = vmul.f32 %v688_v1, %v682_v16 }
  0xb4   :  { %v772_v14 = vadd.f32 %v770_v24, %v754_v26  ;;  %v778_v11 = vadd.f32 %v776_v21, %v760_v53  ;;  %v735_v59 = vadd.f32 %v732_v17, %v1601_v30  ;;  %v742_v27 = vadd.f32 %v739_v4, %v1609_v34 }
  0xb5   :  { %v777_v31 = vmul.f32 %v1907_v38, %v1629_v47  ;;  %v789_v35 = vmul.f32 %v1915_v25, %v1636_v51  ;;  %v795_v39 = vmul.f32 %v1915_v25, %v1639_v52  ;;  %v700_v43 = vsel %vm236_vm0, %v1971_v18, -inf }
  0xb6   :  { %v790_v54 = vadd.f32 %v788_v48, %v772_v14  ;;  %v796_v5 = vadd.f32 %v794_v3, %v778_v11  ;;  %v755_v6 = vadd.f32 %v753_v8, %v735_v59  ;;  %701 = vmax.xlane.f32.xlu1 %v700_v43  ;;  %v761_v19 = vadd.f32 %v759_v9, %v742_v27 }
  0xb7   :  { %v840_v30 = vmul.f32 %v1870_v29, %v1712_v56  ;;  %v847_v34 = vmul.f32 %v1870_v29, %v1718_v58  ;;  %v861_v47 = vmul.f32 %v1872_v40, %v1730_v10  ;;  %v867_v23 = vmul.f32 %v1872_v40, %v1733_v13 }
  0xb8   :  { %v1989_v51 = vmul.f32 %v796_v5, %v790_v54  ;;  %v773_v52 = vadd.f32 %v771_v15, %v755_v6  ;;  %v879_v50 = vmul.f32 %v1879_v32, %v1746_v28  ;;  %v779_v24 = vadd.f32 %v777_v31, %v761_v19  ;;  %v2477_v19 = vld [vmem:[#allocation31_spill] sm:$0xff] }
  0xb9   :  { %v843_v45 = vadd.f32 %v840_v30, %v1715_v57  ;;  %v850_v49 = vadd.f32 %v847_v34, %v1727_v12  ;;  %v885_v7 = vmul.f32 %v1879_v32, %v1757_v33  ;;  %v897_v16 = vmul.f32 %v1885_v46, %v1760_v36  ;;  %v2478_v34 = vld [vmem:[#allocation32_spill] sm:$0xff] }
  0xba   :  { %v806_v21 = vsel %vm236_vm0, %v1989_v51, -inf  ;;  %v791_v63 = vadd.f32 %v789_v35, %v773_v52  ;;  %v903_v48 = vmul.f32 %v1885_v46, %v1775_v44  ;;  %v797_v3 = vadd.f32 %v795_v39, %v779_v24  ;;  %v2480_v24 = vld [vmem:[#allocation35_spill] sm:$0xff] }
  0xbb   :  { %807 = vmax.xlane.f32.xlu0 %v806_v21  ;;  %v863_v1 = vadd.f32 %v861_v47, %v843_v45  ;;  %v869_v26 = vadd.f32 %v867_v23, %v850_v49  ;;  %v841_v53 = vmul.f32 %v1899_v0, %v1712_v56  ;;  %v848_v17 = vmul.f32 %v1899_v0, %v1718_v58  ;;  %v2479_v23 = vld [vmem:[#allocation33_spill] sm:$0xff] }
  0xbc   :  { %v862_v4 = vmul.f32 %v1905_v2, %v1730_v10  ;;  %v868_v8 = vmul.f32 %v1905_v2, %v1733_v13  ;;  %v880_v9 = vmul.f32 %v1907_v38, %v1746_v28  ;;  %v2015_v15 = vmul.f32 %v797_v3, %v791_v63 }
  0xbd   :  { %v881_v14 = vadd.f32 %v879_v50, %v863_v1  ;;  %v887_v11 = vadd.f32 %v885_v7, %v869_v26  ;;  %v844_v59 = vadd.f32 %v841_v53, %v1715_v57  ;;  %v851_v56 = vadd.f32 %v848_v17, %v1727_v12 }
  0xbe   :  { %v886_v58 = vmul.f32 %v1907_v38, %v1757_v33  ;;  %v898_v10 = vmul.f32 %v1915_v25, %v1760_v36  ;;  %v904_v13 = vmul.f32 %v1915_v25, %v1775_v44  ;;  %v809_v28 = vsel %vm236_vm0, %v2015_v15, -inf }
  0xbf   :  { %v899_v27 = vadd.f32 %v897_v16, %v881_v14  ;;  %v905_v31 = vadd.f32 %v903_v48, %v887_v11  ;;  %v864_v35 = vadd.f32 %v862_v4, %v844_v59  ;;  %810 = vmax.xlane.f32.xlu1 %v809_v28  ;;  %v870_v39 = vadd.f32 %v868_v8, %v851_v56  ;;  %v2482_v28 = vld [vmem:[#allocation27_spill] sm:$0xff] }
  0xc0   :  { %v949_v57 = vmul.f32 %v1870_v29, %v1806_v37  ;;  %v956_v12 = vmul.f32 %v1870_v29, %v1816_v42  ;;  %v970_v33 = vmul.f32 %v1872_v40, %v1827_v61  ;;  %v976_v43 = vmul.f32 %v1872_v40, %v1830_v62 }
  0xc1   :  { %v2033_v36 = vmul.f32 %v905_v31, %v899_v27  ;;  %v882_v44 = vadd.f32 %v880_v9, %v864_v35  ;;  %v988_v54 = vmul.f32 %v1879_v32, %v1838_v20  ;;  %v888_v5 = vadd.f32 %v886_v58, %v870_v39  ;;  %v2481_v58 = vld [vmem:[#allocation26_spill] sm:$0xff]  ;;  %v2483_v39 = vld [vmem:[#allocation28_spill] sm:$0xff] }
  0xc2   :  { %v952_v6 = vadd.f32 %v949_v57, %v1813_v41  ;;  %v959_v30 = vadd.f32 %v956_v12, %v2477_v19  ;;  %v994_v29 = vmul.f32 %v1879_v32, %v2478_v34  ;;  %v1006_v50 = vmul.f32 %v1885_v46, %v2479_v23 }
  0xc3   :  { %v915_v47 = vsel %vm236_vm0, %v2033_v36, -inf  ;;  %v900_v52 = vadd.f32 %v898_v10, %v882_v44  ;;  %v1012_v40 = vmul.f32 %v1885_v46, %v2480_v24  ;;  %v906_v45 = vadd.f32 %v904_v13, %v888_v5 }
  0xc4   :  { %916 = vmax.xlane.f32.xlu0 %v915_v47  ;;  %v972_v49 = vadd.f32 %v970_v33, %v952_v6  ;;  %v978_v7 = vadd.f32 %v976_v43, %v959_v30  ;;  %v950_v21 = vmul.f32 %v1899_v0, %v1806_v37  ;;  %v957_v32 = vmul.f32 %v1899_v0, %v1816_v42  ;;  %v2484_v43 = vld [vmem:[#allocation29_spill] sm:$0xff] }
  0xc5   :  { %v971_v63 = vmul.f32 %v1905_v2, %v1827_v61  ;;  %v977_v16 = vmul.f32 %v1905_v2, %v1830_v62  ;;  %v989_v48 = vmul.f32 %v1907_v38, %v1838_v20  ;;  %v2059_v46 = vmul.f32 %v906_v45, %v900_v52 }
  0xc6   :  { %v990_v3 = vadd.f32 %v988_v54, %v972_v49  ;;  %v996_v1 = vadd.f32 %v994_v29, %v978_v7  ;;  %v953_v26 = vadd.f32 %v950_v21, %v1813_v41  ;;  %v960_v37 = vadd.f32 %v957_v32, %v2477_v19  ;;  %v2485_v29 = vld [vmem:[#allocation30_spill] sm:$0xff] }
  0xc7   :  { %v995_v42 = vmul.f32 %v1907_v38, %v2478_v34  ;;  %v1007_v61 = vmul.f32 %v1915_v25, %v2479_v23  ;;  %v918_v62 = vsel %vm236_vm0, %v2059_v46, -inf  ;;  %v1013_v17 = vmul.f32 %v1915_v25, %v2480_v24  ;;  %v2486_v24 = vld [vmem:[#allocation34_spill] sm:$0xff] }
  0xc8   :  { %v1008_v2 = vadd.f32 %v1006_v50, %v990_v3  ;;  %v1014_v0 = vadd.f32 %v1012_v40, %v996_v1  ;;  %v973_v20 = vadd.f32 %v971_v63, %v953_v26  ;;  %919 = vmax.xlane.f32.xlu1 %v918_v62  ;;  %v979_v53 = vadd.f32 %v977_v16, %v960_v37 }
  0xca   :  { %v2071_v41 = vmul.f32 %v1014_v0, %v1008_v2  ;;  %v991_v4 = vadd.f32 %v989_v48, %v973_v20  ;;  %v997_v8 = vadd.f32 %v995_v42, %v979_v53 }
  0xcc   :  { %v1024_v38 = vsel %vm236_vm0, %v2071_v41, -inf  ;;  %v1009_v9 = vadd.f32 %v1007_v61, %v991_v4  ;;  %v1015_v14 = vadd.f32 %v1013_v17, %v997_v8 }
  0xcd   :  { %1025 = vmax.xlane.f32.xlu0 %v1024_v38 }
  0xce   :  { %v2075_v11 = vmul.f32 %v1015_v14, %v1009_v9 }
  0xd0   :  { %v1027_v59 = vsel %vm236_vm0, %v2075_v11, -inf }
  0xd1   :  { %1028 = vmax.xlane.f32.xlu1 %v1027_v59 }
 0x116   :  { %v239_v56 = vpop.xlane.xlu0 %238 }
 0x117   :  { %v243_v10 = vsub.f32 %v2481_v58, %v239_v56 }
 0x119   :  { %v245_v25 = vmul.f32 1.442695, %v243_v10 }
 0x11a   :  { %v348_v13 = vpop.xlane.xlu1 %347 }
 0x11b   :  { %1194 = vpow2.f32 %v245_v25  ;;  %v352_v27 = vsub.f32 %v2482_v28, %v348_v13 }
 0x11d   :  { %v354_v31 = vmul.f32 1.442695, %v352_v27 }
 0x11f   :  { %1196 = vpow2.f32 %v354_v31  ;;  %v242_v35 = vpop.xlane.xlu0 %241 }
 0x120   :  { %v244_v57 = vsub.f32 %v2483_v39, %v242_v35 }
 0x122   :  { %v247_v12 = vmul.f32 1.442695, %v244_v57 }
 0x123   :  { %v351_v33 = vpop.xlane.xlu1 %350 }
 0x124   :  { %v353_v54 = vsub.f32 %v2484_v43, %v351_v33  ;;  %1198 = vpow2.f32 %v247_v12 }
 0x125   :  { %v2082_v44 = vpop.eup %1194 }
 0x126   :  { %v249_v5 = vsel %vm236_vm0, %v2082_v44, 0.0  ;;  %v356_v6 = vmul.f32 1.442695, %v353_v54 }
 0x127   :  { %250 = vadd.xlane.f32.xlu0 %v249_v5 }
 0x128   :  { %1200 = vpow2.f32 %v356_v6 }
 0x129   :  { %v2087_v19 = vpop.eup %1196 }
 0x12a   :  { %v457_v30 = vpop.xlane.xlu0 %456  ;;  %v358_v34 = vsel %vm236_vm0, %v2087_v19, 0.0 }
 0x12b   :  { %v461_v47 = vsub.f32 %v2485_v29, %v457_v30  ;;  %359 = vadd.xlane.f32.xlu0 %v358_v34 }
 0x12d   :  { %v463_v52 = vmul.f32 1.442695, %v461_v47 }
 0x12e   :  { %v2092_v23 = vpop.eup %1198 }
 0x12f   :  { %1202 = vpow2.f32 %v463_v52  ;;  %v460_v50 = vpop.xlane.xlu1 %459  ;;  %v252_v45 = vsel %vm236_vm0, %v2092_v23, 0.0 }
 0x130   :  { %v462_v40 = vsub.f32 %v2486_v24, %v460_v50  ;;  %253 = vadd.xlane.f32.xlu1 %v252_v45  ;;  %v2159_v50 = vld [vmem:[#allocation3] sm:$0xff]  ;;  %v2161_v24 = vstv %s173_s24  ;;  %v2165_v45 = vld [vmem:[#allocation3 + $0x10] sm:$0xff] }
 0x132   :  { %v2097_v49 = vpop.eup %1200  ;;  %v465_v7 = vmul.f32 1.442695, %v462_v40  ;;  %v175_v40 = vmul.f32 %v2161_v24, %v2159_v50 }
 0x133   :  { %v361_v21 = vsel %vm236_vm0, %v2097_v49, 0.0 }
 0x134   :  { %1204 = vpow2.f32 %v465_v7  ;;  %362 = vadd.xlane.f32.xlu1 %v361_v21  ;;  %v2167_v7 = vstv %s158_s25  ;;  %v2169_v21 = vstv %s1077_s26 }
 0x136   :  { %v566_v32 = vpop.xlane.xlu0 %565 }
 0x137   :  { %v570_v63 = vsub.f32 %v1893_v60, %v566_v32  ;;  %v2171_v32 = vstv %s1089_s1 }
 0x139   :  { %v2102_v16 = vpop.eup %1202  ;;  %v572_v48 = vmul.f32 1.442695, %v570_v63  ;;  %v178_v63 = vadd.f32 %v2167_v7, %v175_v40 }
 0x13a   :  { %v467_v3 = vsel %vm236_vm0, %v2102_v16, 0.0 }
 0x13b   :  { %1206 = vpow2.f32 %v572_v48  ;;  %v569_v1 = vpop.xlane.xlu1 %568  ;;  %468 = vadd.xlane.f32.xlu0 %v467_v3  ;;  %v194_v48 = vmul.f32 %v2169_v21, %v2165_v45 }
 0x13c   :  { %v571_v26 = vsub.f32 %v1927_v55, %v569_v1  ;;  %v2176_v1 = vld [vmem:[#allocation3 + $0x20] sm:$0xff] }
 0x13e   :  { %v2107_v37 = vpop.eup %1204  ;;  %v574_v42 = vmul.f32 1.442695, %v571_v26  ;;  %v2178_v26 = vstv %s1080_s4 }
 0x13f   :  { %v699_v61 = vpop.xlane.xlu0 %698  ;;  %v470_v62 = vsel %vm236_vm0, %v2107_v37, 0.0 }
 0x140   :  { %1208 = vpow2.f32 %v574_v42  ;;  %v703_v60 = vsub.f32 %v1945_v22, %v699_v61  ;;  %471 = vadd.xlane.f32.xlu1 %v470_v62  ;;  %v285_v42 = vmul.f32 %v2171_v32, %v2159_v50  ;;  %v2182_v61 = vstv %s1086_s29 }
 0x141   :  { %v2184_v62 = vstv %s1092_s30 }
 0x142   :  { %v705_v2 = vmul.f32 1.442695, %v703_v60  ;;  %v196_v60 = vadd.f32 %v194_v48, %v178_v63 }
 0x143   :  { %v702_v0 = vpop.xlane.xlu1 %701 }
 0x144   :  { %1210 = vpow2.f32 %v705_v2  ;;  %v704_v53 = vsub.f32 %v1971_v18, %v702_v0  ;;  %v212_v2 = vmul.f32 %v2178_v26, %v2176_v1  ;;  %v2188_v0 = vld [vmem:[#allocation3 + $0x8] sm:$0xff] }
 0x145   :  { %v2112_v20 = vpop.eup %1206 }
 0x146   :  { %v576_v55 = vsel %vm236_vm0, %v2112_v20, 0.0  ;;  %v707_v17 = vmul.f32 1.442695, %v704_v53  ;;  %v2190_v53 = vld [vmem:[#allocation3 + $0x30] sm:$0xff] }
 0x147   :  { %577 = vadd.xlane.f32.xlu0 %v576_v55  ;;  %v2192_v55 = vstv %s1083_s10 }
 0x148   :  { %v808_v4 = vpop.xlane.xlu0 %807  ;;  %1212 = vpow2.f32 %v707_v17  ;;  %v288_v17 = vadd.f32 %v2182_v61, %v285_v42 }
 0x149   :  { %v812_v8 = vsub.f32 %v1989_v51, %v808_v4  ;;  %v304_v4 = vmul.f32 %v2184_v62, %v2165_v45 }
 0x14a   :  { %v2118_v38 = vpop.eup %1208 }
 0x14b   :  { %v814_v22 = vmul.f32 1.442695, %v812_v8  ;;  %v579_v9 = vsel %vm236_vm0, %v2118_v38, 0.0 }
 0x14c   :  { %580 = vadd.xlane.f32.xlu1 %v579_v9  ;;  %v811_v14 = vpop.xlane.xlu1 %810  ;;  %v176_v9 = vmul.f32 %v2161_v24, %v2188_v0 }
 0x14d   :  { %1214 = vpow2.f32 %v814_v22  ;;  %v813_v18 = vsub.f32 %v2015_v15, %v811_v14  ;;  %v2197_v22 = vstv %s1095_s11  ;;  %v214_v14 = vadd.f32 %v212_v2, %v196_v60 }
 0x14e   :  { %v2122_v59 = vpop.eup %1210 }
 0x14f   :  { %v709_v56 = vsel %vm236_vm0, %v2122_v59, 0.0  ;;  %v816_v58 = vmul.f32 1.442695, %v813_v18  ;;  %v230_v18 = vmul.f32 %v2192_v55, %v2190_v53 }
 0x150   :  { %710 = vadd.xlane.f32.xlu0 %v709_v56  ;;  %v2203_v56 = vld [vmem:[#allocation3 + $0x18] sm:$0xff] }
 0x151   :  { %v917_v10 = vpop.xlane.xlu0 %916  ;;  %1216 = vpow2.f32 %v816_v58  ;;  %v2208_v58 = vstv %s2451_s8  ;;  %s1110_s8 = sld [smem:[#allocation15 + $0x102]]  ;;  %v305_v40 = vmul.f32 %v2184_v62, %v2203_v56 }
 0x152   :  { %v921_v51 = vsub.f32 %v2033_v36, %v917_v10  ;;  %v2128_v25 = vpop.eup %1212  ;;  %v306_v10 = vadd.f32 %v304_v4, %v288_v17  ;;  %v2240_v17 = vstv %s1101_s6  ;;  %v2242_v4 = vstv %s1107_s7 }
 0x153   :  { %v712_v28 = vsel %vm236_vm0, %v2128_v25, 0.0 }
 0x154   :  { %v923_v13 = vmul.f32 1.442695, %v921_v51  ;;  %713 = vadd.xlane.f32.xlu1 %v712_v28  ;;  %v322_v51 = vmul.f32 %v2197_v22, %v2176_v1 }
 0x155   :  { %v920_v27 = vpop.xlane.xlu1 %919 }
 0x156   :  { %1218 = vpow2.f32 %v923_v13  ;;  %v922_v15 = vsub.f32 %v2059_v46, %v920_v27  ;;  %v2212_v13 = vstv %s1098_s12  ;;  %v179_v27 = vadd.f32 %v2167_v7, %v176_v9 }
 0x157   :  { %v2132_v31 = vpop.eup %1214 }
 0x158   :  { %v818_v35 = vsel %vm236_vm0, %v2132_v31, 0.0  ;;  %v925_v39 = vmul.f32 1.442695, %v922_v15  ;;  %v195_v15 = vmul.f32 %v2169_v21, %v2203_v56 }
 0x159   :  { %819 = vadd.xlane.f32.xlu0 %v818_v35 }
 0x15a   :  { %v1026_v57 = vpop.xlane.xlu0 %1025  ;;  %1220 = vpow2.f32 %v925_v39  ;;  %v286_v39 = vmul.f32 %v2171_v32, %v2188_v0 }
 0x15b   :  { %v1030_v36 = vsub.f32 %v2071_v41, %v1026_v57  ;;  %v2138_v12 = vpop.eup %1216  ;;  %v232_v57 = vadd.f32 %v230_v18, %v214_v14 }
 0x15c   :  { %v821_v43 = vsel %vm236_vm0, %v2138_v12, 0.0 }
 0x15d   :  { %v1032_v33 = vmul.f32 1.442695, %v1030_v36  ;;  %822 = vadd.xlane.f32.xlu1 %v821_v43  ;;  %v324_v43 = vadd.f32 %v322_v51, %v306_v10 }
 0x15e   :  { %v1029_v54 = vpop.xlane.xlu1 %1028 }
 0x15f   :  { %1222 = vpow2.f32 %v1032_v33  ;;  %v1031_v46 = vsub.f32 %v2075_v11, %v1029_v54  ;;  %v2220_v33 = vld [vmem:[#allocation3 + $0x28] sm:$0xff]  ;;  %v340_v54 = vmul.f32 %v2212_v13, %v2190_v53 }
 0x160   :  { %v2142_v5 = vpop.eup %1218  ;;  %v323_v18 = vmul.f32 %v2197_v22, %v2220_v33 }
 0x161   :  { %v927_v6 = vsel %vm236_vm0, %v2142_v5, 0.0  ;;  %v1034_v30 = vmul.f32 1.442695, %v1031_v46  ;;  %v342_v42 = vadd.f32 %v340_v54, %v324_v43 }
 0x162   :  { %928 = vadd.xlane.f32.xlu0 %v927_v6  ;;  %v2225_v6 = vstv %s1104_s13 }
 0x163   :  { %1224 = vpow2.f32 %v1034_v30  ;;  %v2227_v30 = vld [vmem:[#allocation3 + $0x38] sm:$0xff]  ;;  %v394_v60 = vmul.f32 %v2225_v6, %v2159_v50  ;;  %v395_v10 = vmul.f32 %v2225_v6, %v2188_v0 }
 0x164   :  { %v2147_v41 = vpop.eup %1220  ;;  %v231_v2 = vmul.f32 %v2192_v55, %v2227_v30  ;;  %v341_v43 = vmul.f32 %v2212_v13, %v2227_v30 }
 0x165   :  { %v930_v34 = vsel %vm236_vm0, %v2147_v41, 0.0  ;;  %v398_v54 = vadd.f32 %v2240_v17, %v395_v10  ;;  %v2277_v10 = vstv %s1116_s3 }
 0x166   :  { %931 = vadd.xlane.f32.xlu1 %v930_v34  ;;  %v197_v34 = vadd.f32 %v195_v15, %v179_v27  ;;  %v413_v27 = vmul.f32 %v2242_v4, %v2165_v45 }
 0x169   :  { %v2151_v29 = vpop.eup %1222 }
 0x16a   :  { %v1036_v47 = vsel %vm236_vm0, %v2151_v29, 0.0 }
 0x16b   :  { %1037 = vadd.xlane.f32.xlu0 %v1036_v47  ;;  %v213_v47 = vmul.f32 %v2178_v26, %v2220_v33 }
 0x16d   :  { %v2155_v52 = vpop.eup %1224 }
 0x16e   :  { %v1039_v11 = vsel %vm236_vm0, %v2155_v52, 0.0 }
 0x16f   :  { %1040 = vadd.xlane.f32.xlu1 %v1039_v11  ;;  %v289_v11 = vadd.f32 %v2182_v61, %v286_v39  ;;  %v2252_v39 = vstv %s1110_s8 }
 0x171   :  { %v307_v14 = vadd.f32 %v305_v40, %v289_v11  ;;  %v431_v11 = vmul.f32 %v2252_v39, %v2176_v1 }
 0x1b4   :  { %v251_v3 = vpop.xlane.xlu0 %250 }
 0x1b5   :  { %1226 = vrcp.f32 %v251_v3 }
 0x1b8   :  { %v360_v8 = vpop.xlane.xlu0 %359 }
 0x1b9   :  { %1228 = vrcp.f32 %v360_v8  ;;  %v215_v8 = vadd.f32 %v213_v47, %v197_v34 }
 0x1bd   :  { %v254_v35 = vpop.xlane.xlu1 %253 }
 0x1be   :  { %1230 = vrcp.f32 %v254_v35 }
 0x1bf   :  { %v1227_v28 = vpop.eup %1226 }
 0x1c0   :  { %v258_v36 = vmul.f32 %v1227_v28, %v2208_v58  ;;  %v397_v28 = vadd.f32 %v2240_v17, %v394_v60 }
 0x1c1   :  { %v363_v63 = vpop.xlane.xlu1 %362 }
 0x1c2   :  { %v260_v46 = vmul.f32 %v2082_v44, %v258_v36  ;;  %1232 = vrcp.f32 %v363_v63  ;;  %v325_v36 = vadd.f32 %v323_v18, %v307_v14  ;;  %v415_v47 = vadd.f32 %v413_v27, %v397_v28 }
 0x1c3   :  { %v1229_v48 = vpop.eup %1228  ;;  %v2264_v63 = vstv %s1113_s16 }
 0x1c4   :  { %v262_v3 = vadd.f32 %v260_v46, %v232_v57  ;;  %v366_v44 = vmul.f32 %v1229_v48, %v2208_v58  ;;  %v414_v46 = vmul.f32 %v2242_v4, %v2203_v56  ;;  %v449_v14 = vmul.f32 %v2264_v63, %v2190_v53 }
 0x1c6   :  { %264 = vst.msk [vmem:[#allocation18] sm:$0xff] %vm236_vm0, %v262_v3  ;;  %v368_v9 = vmul.f32 %v2087_v19, %v366_v44  ;;  %v233_v19 = vadd.f32 %v231_v2, %v215_v8  ;;  %v2266_v3 = vstv %s1119_s17  ;;  %v343_v44 = vadd.f32 %v341_v43, %v325_v36 }
 0x1c7   :  { %v416_v2 = vadd.f32 %v414_v46, %v398_v54  ;;  %v503_v18 = vmul.f32 %v2266_v3, %v2159_v50  ;;  %v2288_v43 = vstv %s1125_s19  ;;  %v504_v54 = vmul.f32 %v2266_v3, %v2188_v0 }
 0x1c8   :  { %v370_v51 = vadd.f32 %v368_v9, %v342_v42  ;;  %v469_v15 = vpop.xlane.xlu0 %468  ;;  %v1231_v35 = vpop.eup %1230  ;;  %v433_v9 = vadd.f32 %v431_v11, %v415_v47 }
 0x1c9   :  { %1234 = vrcp.f32 %v469_v15  ;;  %v259_v57 = vmul.f32 %v1231_v35, %v2208_v58  ;;  %v450_v35 = vmul.f32 %v2264_v63, %v2227_v30 }
 0x1ca   :  { %373 = vst.msk [vmem:[#allocation18 + $0x10] sm:$0xff] %vm236_vm0, %v370_v51  ;;  %v2279_v51 = vstv %s1122_s5 }
 0x1cb   :  { %v261_v34 = vmul.f32 %v2092_v23, %v259_v57  ;;  %v432_v23 = vmul.f32 %v2252_v39, %v2220_v33  ;;  %v506_v57 = vadd.f32 %v2277_v10, %v503_v18  ;;  %v522_v50 = vmul.f32 %v2279_v51, %v2165_v45 }
 0x1cc   :  { %v1233_v40 = vpop.eup %1232  ;;  %v523_v0 = vmul.f32 %v2279_v51, %v2203_v56  ;;  %v541_v56 = vmul.f32 %v2288_v43, %v2220_v33 }
 0x1cd   :  { %v472_v48 = vpop.xlane.xlu1 %471  ;;  %v263_v42 = vadd.f32 %v261_v34, %v233_v19  ;;  %v367_v60 = vmul.f32 %v1233_v40, %v2208_v58  ;;  %v434_v15 = vadd.f32 %v432_v23, %v416_v2  ;;  %v2293_v34 = vld [vmem:[#allocation3 + $0x40] sm:$0xff]  ;;  %v2306_v23 = vld [vmem:[#allocation3 + $0x50] sm:$0xff] }
 0x1ce   :  { %1236 = vrcp.f32 %v472_v48  ;;  %v524_v48 = vadd.f32 %v522_v50, %v506_v57 }
 0x1cf   :  { %265 = vst.msk [vmem:[#allocation18 + $0x8] sm:$0xff] %vm236_vm0, %v263_v42  ;;  %v369_v8 = vmul.f32 %v2097_v49, %v367_v60  ;;  %v451_v49 = vadd.f32 %v449_v14, %v433_v9  ;;  %v452_v47 = vadd.f32 %v450_v35, %v434_v15  ;;  %v540_v42 = vmul.f32 %v2288_v43, %v2176_v1 }
 0x1d0   :  { %v507_v60 = vadd.f32 %v2277_v10, %v504_v54  ;;  %v655_v15 = vmul.f32 %v2306_v23, %v2169_v21 }
 0x1d1   :  { %v371_v28 = vadd.f32 %v369_v8, %v343_v44  ;;  %v2297_v44 = vstv %s1128_s20  ;;  %v2309_v8 = vld [vmem:[#allocation3 + $0x48] sm:$0xff]  ;;  %v542_v9 = vadd.f32 %v540_v42, %v524_v48  ;;  %v745_v42 = vmul.f32 %v2293_v34, %v2171_v32 }
 0x1d2   :  { %v558_v14 = vmul.f32 %v2297_v44, %v2190_v53  ;;  %v2323_v53 = vld [vmem:[#allocation3 + $0x58] sm:$0xff] }
 0x1d3   :  { %v1235_v27 = vpop.eup %1234  ;;  %374 = vst.msk [vmem:[#allocation18 + $0x18] sm:$0xff] %vm236_vm0, %v371_v28  ;;  %v525_v28 = vadd.f32 %v523_v0, %v507_v60 }
 0x1d4   :  { %v475_v19 = vmul.f32 %v1235_v27, %v2208_v58  ;;  %v578_v36 = vpop.xlane.xlu0 %577  ;;  %v560_v33 = vadd.f32 %v558_v14, %v542_v9  ;;  %v764_v9 = vmul.f32 %v2306_v23, %v2184_v62 }
 0x1d5   :  { %1238 = vrcp.f32 %v578_v36  ;;  %v543_v50 = vadd.f32 %v541_v56, %v525_v28  ;;  %v559_v36 = vmul.f32 %v2297_v44, %v2227_v30  ;;  %v746_v28 = vmul.f32 %v2309_v8, %v2171_v32 }
 0x1d6   :  { %v477_v46 = vmul.f32 %v2102_v16, %v475_v19  ;;  %v636_v16 = vmul.f32 %v2293_v34, %v2161_v24  ;;  %v765_v32 = vmul.f32 %v2323_v53, %v2184_v62 }
 0x1d7   :  { %v561_v0 = vadd.f32 %v559_v36, %v543_v50  ;;  %v749_v50 = vadd.f32 %v746_v28, %v2182_v61  ;;  %v963_v28 = vmul.f32 %v2293_v34, %v2266_v3 }
 0x1d8   :  { %v1237_v11 = vpop.eup %1236  ;;  %v479_v40 = vadd.f32 %v477_v46, %v451_v49  ;;  %v639_v27 = vadd.f32 %v636_v16, %v2167_v7  ;;  %v2318_v49 = vld [vmem:[#allocation3 + $0x60] sm:$0xff] }
 0x1d9   :  { %v476_v45 = vmul.f32 %v1237_v11, %v2208_v58  ;;  %v581_v2 = vpop.xlane.xlu1 %580  ;;  %v673_v46 = vmul.f32 %v2318_v49, %v2178_v26  ;;  %v2331_v11 = vld [vmem:[#allocation3 + $0x70] sm:$0xff] }
 0x1da   :  { %482 = vst.msk [vmem:[#allocation18 + $0x20] sm:$0xff] %vm236_vm0, %v479_v40  ;;  %1240 = vrcp.f32 %v581_v2  ;;  %v657_v54 = vadd.f32 %v655_v15, %v639_v27  ;;  %v656_v40 = vmul.f32 %v2323_v53, %v2169_v21  ;;  %v691_v16 = vmul.f32 %v2331_v11, %v2192_v55 }
 0x1db   :  { %v478_v1 = vmul.f32 %v2107_v37, %v476_v45  ;;  %v637_v37 = vmul.f32 %v2309_v8, %v2161_v24  ;;  %v2338_v45 = vld [vmem:[#allocation3 + $0x68] sm:$0xff] }
 0x1dc   :  { %v674_v21 = vmul.f32 %v2338_v45, %v2178_v26 }
 0x1dd   :  { %v480_v18 = vadd.f32 %v478_v1, %v452_v47  ;;  %v711_v35 = vpop.xlane.xlu0 %710  ;;  %v640_v24 = vadd.f32 %v637_v37, %v2167_v7  ;;  %v748_v1 = vadd.f32 %v745_v42, %v2182_v61  ;;  %v783_v61 = vmul.f32 %v2338_v45, %v2197_v22 }
 0x1de   :  { %1242 = vrcp.f32 %v711_v35  ;;  %v873_v42 = vmul.f32 %v2306_v23, %v2242_v4 }
 0x1df   :  { %v1239_v19 = vpop.eup %1238  ;;  %483 = vst.msk [vmem:[#allocation18 + $0x28] sm:$0xff] %vm236_vm0, %v480_v18  ;;  %v658_v7 = vadd.f32 %v656_v40, %v640_v24  ;;  %v2350_v18 = vld [vmem:[#allocation3 + $0x78] sm:$0xff] }
 0x1e0   :  { %v584_v57 = vmul.f32 %v1239_v19, %v2208_v58  ;;  %v692_v19 = vmul.f32 %v2350_v18, %v2192_v55 }
 0x1e1   :  { %v714_v48 = vpop.xlane.xlu1 %713  ;;  %v676_v26 = vadd.f32 %v674_v21, %v658_v7 }
 0x1e2   :  { %v586_v47 = vmul.f32 %v2112_v20, %v584_v57  ;;  %1244 = vrcp.f32 %v714_v48  ;;  %v675_v20 = vadd.f32 %v673_v46, %v657_v54  ;;  %v782_v57 = vmul.f32 %v2318_v49, %v2197_v22 }
 0x1e3   :  { %v854_v54 = vmul.f32 %v2293_v34, %v2225_v6  ;;  %v800_v48 = vmul.f32 %v2331_v11, %v2212_v13  ;;  %v801_v22 = vmul.f32 %v2350_v18, %v2212_v13  ;;  %v982_v34 = vmul.f32 %v2306_v23, %v2279_v51 }
 0x1e4   :  { %v1241_v30 = vpop.eup %1240  ;;  %v588_v60 = vadd.f32 %v586_v47, %v560_v33  ;;  %v693_v35 = vadd.f32 %v691_v16, %v675_v20  ;;  %v766_v33 = vadd.f32 %v764_v9, %v748_v1  ;;  %v694_v47 = vadd.f32 %v692_v19, %v676_v26 }
 0x1e5   :  { %v585_v2 = vmul.f32 %v1241_v30, %v2208_v58  ;;  %v857_v62 = vadd.f32 %v854_v54, %v2240_v17  ;;  %v891_v9 = vmul.f32 %v2318_v49, %v2252_v39  ;;  %v909_v26 = vmul.f32 %v2331_v11, %v2264_v63 }
 0x1e6   :  { %591 = vst.msk [vmem:[#allocation18 + $0x30] sm:$0xff] %vm236_vm0, %v588_v60  ;;  %v820_v14 = vpop.xlane.xlu0 %819  ;;  %v784_v40 = vadd.f32 %v782_v57, %v766_v33  ;;  %v964_v57 = vmul.f32 %v2309_v8, %v2266_v3  ;;  %v1000_v23 = vmul.f32 %v2318_v49, %v2288_v43  ;;  %v983_v3 = vmul.f32 %v2323_v53, %v2279_v51 }
 0x1e7   :  { %v587_v56 = vmul.f32 %v2118_v38, %v585_v2  ;;  %1246 = vrcp.f32 %v820_v14  ;;  %v875_v1 = vadd.f32 %v873_v42, %v857_v62  ;;  %v1018_v49 = vmul.f32 %v2331_v11, %v2297_v44 }
 0x1e8   :  { %v1243_v27 = vpop.eup %1242  ;;  %v802_v16 = vadd.f32 %v800_v48, %v784_v40 }
 0x1e9   :  { %v589_v15 = vadd.f32 %v587_v56, %v561_v0  ;;  %v717_v37 = vmul.f32 %v1243_v27, %v2208_v58  ;;  %v855_v0 = vmul.f32 %v2309_v8, %v2225_v6  ;;  %v874_v6 = vmul.f32 %v2323_v53, %v2242_v4 }
 0x1ea   :  { %v823_v36 = vpop.xlane.xlu1 %822  ;;  %v966_v4 = vadd.f32 %v963_v28, %v2277_v10 }
 0x1eb   :  { %592 = vst.msk [vmem:[#allocation18 + $0x38] sm:$0xff] %vm236_vm0, %v589_v15  ;;  %v719_v38 = vmul.f32 %v2122_v59, %v717_v37  ;;  %1248 = vrcp.f32 %v823_v36  ;;  %v767_v59 = vadd.f32 %v765_v32, %v749_v50  ;;  %v858_v14 = vadd.f32 %v855_v0, %v2240_v17 }
 0x1ec   :  { %v1245_v46 = vpop.eup %1244  ;;  %v893_v37 = vadd.f32 %v891_v9, %v875_v1  ;;  %v892_v17 = vmul.f32 %v2338_v45, %v2252_v39  ;;  %v910_v39 = vmul.f32 %v2350_v18, %v2264_v63 }
 0x1ed   :  { %v721_v55 = vadd.f32 %v719_v38, %v693_v35  ;;  %v718_v24 = vmul.f32 %v1245_v46, %v2208_v58  ;;  %v785_v21 = vadd.f32 %v783_v61, %v767_v59  ;;  %v984_v46 = vadd.f32 %v982_v34, %v966_v4 }
 0x1ee   :  { %v911_v32 = vadd.f32 %v909_v26, %v893_v37 }
 0x1ef   :  { %724 = vst.msk [vmem:[#allocation18 + $0x40] sm:$0xff] %vm236_vm0, %v721_v55  ;;  %v929_v30 = vpop.xlane.xlu0 %928  ;;  %v720_v60 = vmul.f32 %v2128_v25, %v718_v24  ;;  %v803_v15 = vadd.f32 %v801_v22, %v785_v21  ;;  %v967_v55 = vadd.f32 %v964_v57, %v2277_v10  ;;  %v1002_v48 = vadd.f32 %v1000_v23, %v984_v46 }
 0x1f0   :  { %1250 = vrcp.f32 %v929_v30  ;;  %v1019_v30 = vmul.f32 %v2350_v18, %v2297_v44 }
 0x1f1   :  { %v1247_v2 = vpop.eup %1246  ;;  %v722_v20 = vadd.f32 %v720_v60, %v694_v47  ;;  %v985_v59 = vadd.f32 %v983_v3, %v967_v55  ;;  %v1020_v61 = vadd.f32 %v1018_v49, %v1002_v48 }
 0x1f2   :  { %v826_v7 = vmul.f32 %v1247_v2, %v2208_v58 }
 0x1f3   :  { %725 = vst.msk [vmem:[#allocation18 + $0x48] sm:$0xff] %vm236_vm0, %v722_v20  ;;  %v932_v56 = vpop.xlane.xlu1 %931 }
 0x1f4   :  { %v828_v25 = vmul.f32 %v2132_v31, %v826_v7  ;;  %1252 = vrcp.f32 %v932_v56  ;;  %v876_v31 = vadd.f32 %v874_v6, %v858_v14 }
 0x1f5   :  { %v1249_v27 = vpop.eup %1248 }
 0x1f6   :  { %v830_v13 = vadd.f32 %v828_v25, %v802_v16  ;;  %v827_v35 = vmul.f32 %v1249_v27, %v2208_v58  ;;  %v894_v54 = vadd.f32 %v892_v17, %v876_v31 }
 0x1f8   :  { %833 = vst.msk [vmem:[#allocation18 + $0x50] sm:$0xff] %vm236_vm0, %v830_v13  ;;  %v1038_v19 = vpop.xlane.xlu0 %1037  ;;  %v829_v33 = vmul.f32 %v2138_v12, %v827_v35  ;;  %v912_v40 = vadd.f32 %v910_v39, %v894_v54 }
 0x1f9   :  { %1254 = vrcp.f32 %v1038_v19 }
 0x1fa   :  { %v1251_v38 = vpop.eup %1250  ;;  %v831_v50 = vadd.f32 %v829_v33, %v803_v15 }
 0x1fb   :  { %v935_v36 = vmul.f32 %v1251_v38, %v2208_v58 }
 0x1fc   :  { %834 = vst.msk [vmem:[#allocation18 + $0x58] sm:$0xff] %vm236_vm0, %v831_v50  ;;  %v1041_v8 = vpop.xlane.xlu1 %1040 }
 0x1fd   :  { %v937_v12 = vmul.f32 %v2142_v5, %v935_v36  ;;  %1256 = vrcp.f32 %v1041_v8  ;;  %v1001_v5 = vmul.f32 %v2338_v45, %v2288_v43 }
 0x1fe   :  { %v1253_v47 = vpop.eup %1252 }
 0x1ff   :  { %v939_v24 = vadd.f32 %v937_v12, %v911_v32  ;;  %v936_v63 = vmul.f32 %v1253_v47, %v2208_v58  ;;  %v1003_v42 = vadd.f32 %v1001_v5, %v985_v59 }
 0x201   :  { %942 = vst.msk [vmem:[#allocation18 + $0x60] sm:$0xff] %vm236_vm0, %v939_v24  ;;  %v938_v10 = vmul.f32 %v2147_v41, %v936_v63  ;;  %v1021_v2 = vadd.f32 %v1019_v30, %v1003_v42 }
 0x203   :  { %v1255_v51 = vpop.eup %1254  ;;  %v940_v53 = vadd.f32 %v938_v10, %v912_v40 }
 0x204   :  { %v1044_v62 = vmul.f32 %v1255_v51, %v2208_v58 }
 0x205   :  { %943 = vst.msk [vmem:[#allocation18 + $0x68] sm:$0xff] %vm236_vm0, %v940_v53 }
 0x206   :  { %v1046_v11 = vmul.f32 %v2151_v29, %v1044_v62 }
 0x207   :  { %v1257_v60 = vpop.eup %1256 }
 0x208   :  { %v1048_v0 = vadd.f32 %v1046_v11, %v1020_v61  ;;  %v1045_v43 = vmul.f32 %v1257_v60, %v2208_v58 }
 0x20a   :  { %1051 = vst.msk [vmem:[#allocation18 + $0x70] sm:$0xff] %vm236_vm0, %v1048_v0  ;;  %v1047_v41 = vmul.f32 %v2155_v52, %v1045_v43 }
 0x20c   :  { %v1049_v45 = vadd.f32 %v1047_v41, %v1021_v2 }
 0x20e   :  { %1052 = vst.msk [vmem:[#allocation18 + $0x78] sm:$0xff] %vm236_vm0, %v1049_v45 }
 0x20f   :  { %1385 = shalt.err (!%p1382_p8)
}
 0x210   :  { %s1386_s23 = scalar_lea.hbm %s2452_s9, 2048 }
 0x211   :  { %p1387_p9 = scmp.ne.s32.totalorder %s2452_s9, %s1386_s23  ;;  %p1390_p10 = scmp.lt.u32.totalorder %s1386_s23, %s2452_s9 }
 0x213   :  { %p1392_p11 = pnand %p1390_p10, %p1387_p9 }
 0x215   :  { %1395 = shalt.err (!%p1392_p11)
}
 0x216   :  { %1064 = dma.vmem_to_hbm [thread:$0]  %s1059_s2, 2048, %s2452_s9, [#allocation5], %s1413_s27, %s1413_s27, %s1414_s28  }
 0x217   :  { %1408 = dma.done.wait [#allocation5], 2048  }
 0x218   :  { %1409 = vsyncadd [#allocation5], 4294965248 }
 0x219   :  { %1068 = vsyncpa [#allocation4], 1 }
 0x21a   :  { %1069 = vsyncpa [#allocation8], 1 }
 0x21b   :  { %1070 = vsyncpa [#allocation5], 1 }
 0x21c   :  { %1071 = vsyncpa [#allocation6], 1 }
 0x21d   :  { %1072 = vsyncpa [#allocation11], 1 }
 0x21e   :  { %1073 = vsyncpa [#allocation14], 1 }
 0x21f   :  { %1074 = vsyncpa [#allocation17], 1 }

</bundles_post_ra>
